<compile_context>
chip_gen: v7x
topology: tpu7x:2x2x1
jax: 0.10.0
libtpu: 0.0.40
codegen_flags: <defaults>
</compile_context>

<pallas_src>
import jax
import jax.numpy as jnp
from jax.experimental import pallas as pl
from jax.experimental.pallas import tpu as pltpu

IN = 784          # input features (28*28)
HID = 400         # hidden width
LATENT = 10       # true latent width
LATENT_PAD = 128  # lane-padded latent width


def _round_up(n, m):
    return (n + m - 1) // m * m


def _select_tiling():
    """Pick (max batch tile, vmem_limit_bytes) from the local TPU generation."""
    try:
        kind = jax.devices()[0].device_kind.lower()
    except Exception:
        kind = ""
    if "v7" in kind:
        # v7x: 64 MiB VMEM per TensorCore -> cap tile at 512 rows, keep headroom.
        return 512, 30 << 20
    if any(g in kind for g in ("v6", "v5", "v4")):
        # 128 MiB VMEM: big tiles amortize ~0.35 us/step grid overhead
        # (measured: 256-row tiles ~63% of HBM roofline, 1024 ~86%).
        return 1024, 48 << 20
    return 512, 30 << 20  # unknown chip: conservative


TILE_B_MAX, VMEM_LIMIT = _select_tiling()


def _vae_kernel(x_ref, w1_ref, b1_ref, w2p_ref, b2p_ref, w3p_ref, b3_ref,
                w4_ref, b4_ref, eps_ref, recon_ref, h2_ref):
    # ---- encoder: Linear(784, 400) -> ReLU (bf16 matmul, f32 accumulate) -----
    h1 = jnp.dot(x_ref[...], w1_ref[...], preferred_element_type=jnp.float32)
    h1 = jnp.maximum(h1 + b1_ref[...], 0.0)                     # (tb, 400) f32

    # ---- fused encoder head: one (400, 256) matmul, mu | logvar packed -------
    h2 = jnp.dot(h1.astype(jnp.bfloat16), w2p_ref[...],
                 preferred_element_type=jnp.float32) + b2p_ref[...]
    h2_ref[...] = h2                                            # single writeback
    mu = h2[:, :LATENT_PAD]          # lanes 0:10 real; padded lanes exactly 0
    logvar = h2[:, LATENT_PAD:]      # lanes 0:10 real; padded lanes exactly 0

    # ---- reparameterize (f32): z = mu + eps * exp(0.5 * logvar) --------------
    # Padded lanes: mu=0, logvar=0 -> std=1, eps=0 -> z=0 (w3 pad rows are 0).
    z = mu + eps_ref[...] * jnp.exp(0.5 * logvar)               # (tb, 128) f32

    # ---- decoder: Linear(10->128pad, 400) -> ReLU -> Linear(400, 784) --------
    d1 = jnp.dot(z.astype(jnp.bfloat16), w3p_ref[...],
                 preferred_element_type=jnp.float32)
    d1 = jnp.maximum(d1 + b3_ref[...], 0.0)                     # (tb, 400) f32
    logits = jnp.dot(d1.astype(jnp.bfloat16), w4_ref[...],
                     preferred_element_type=jnp.float32) + b4_ref[...]

    # ---- sigmoid epilogue: single EUP tanh, exact [0, 1] range, bf16 store ---
    recon_ref[...] = (0.5 + 0.5 * jnp.tanh(0.5 * logits)).astype(recon_ref.dtype)


def pack_params(params):
    """One-time packing / padding / bf16 cast of the weights (hot-path free)."""
    (w1, b1, w2, b2, w3, b3, w4, b4) = params

    w2p = jnp.zeros((HID, 2 * LATENT_PAD), jnp.float32)
    w2p = w2p.at[:, :LATENT].set(w2[:, :LATENT])                         # mu cols
    w2p = w2p.at[:, LATENT_PAD:LATENT_PAD + LATENT].set(w2[:, LATENT:])  # logvar
    b2p = jnp.zeros((1, 2 * LATENT_PAD), jnp.float32)
    b2p = b2p.at[:, :LATENT].set(b2[:, :LATENT])
    b2p = b2p.at[:, LATENT_PAD:LATENT_PAD + LATENT].set(b2[:, LATENT:])
    w3p = jnp.zeros((LATENT_PAD, HID), jnp.float32).at[:LATENT, :].set(w3)

    return (w1.astype(jnp.bfloat16), b1.astype(jnp.float32),
            w2p.astype(jnp.bfloat16), b2p.astype(jnp.float32),
            w3p.astype(jnp.bfloat16), b3.astype(jnp.float32),
            w4.astype(jnp.bfloat16), b4.astype(jnp.float32))


def vae_forward(x, packed_params, eps):
    """x: any shape reshapable to (-1, 784). Returns (recon[bf16], mu, logvar)."""
    x2d = x.reshape(-1, IN)
    B = x2d.shape[0]
    (w1b, b1, w2pb, b2p, w3pb, b3, w4b, b4) = packed_params

    # --- batch tiling (>=2 grid steps when possible so v7x uses both TCs) -----
    Bp = _round_up(B, 16)                 # bf16 packs 16 rows / sublane tile
    if Bp > 16:
        tile_b = min(TILE_B_MAX, _round_up(-(-Bp // 2), 16))
    else:
        tile_b = Bp
    Bp = _round_up(Bp, tile_b)

    x_in = x2d.astype(jnp.bfloat16)
    if Bp != B:                           # skip the pad copy when tile-aligned
        x_in = jnp.pad(x_in, ((0, Bp - B), (0, 0)))
    eps_in = jnp.pad(eps.astype(jnp.float32),
                     ((0, Bp - B), (0, LATENT_PAD - LATENT)))

    grid = (Bp // tile_b,)

    def batch_spec(feat):
        return pl.BlockSpec((tile_b, feat), lambda i: (i, 0))

    def resident(shape):
        return pl.BlockSpec(shape, lambda i: (0, 0))

    out_shape = (
        jax.ShapeDtypeStruct((Bp, IN), jnp.bfloat16),           # recon (bf16!)
        jax.ShapeDtypeStruct((Bp, 2 * LATENT_PAD), jnp.float32),  # packed mu|logvar
    )

    recon, h2 = pl.pallas_call(
        _vae_kernel,
        grid=grid,
        out_shape=out_shape,
        in_specs=[
            batch_spec(IN),                   # x
            resident((IN, HID)),              # w1
            resident((1, HID)),               # b1
            resident((HID, 2 * LATENT_PAD)),  # w2 packed (mu | logvar)
            resident((1, 2 * LATENT_PAD)),    # b2 packed
            resident((LATENT_PAD, HID)),      # w3 zero-padded rows
            resident((1, HID)),               # b3
            resident((HID, IN)),              # w4
            resident((1, IN)),                # b4
            batch_spec(LATENT_PAD),           # eps (lane-padded with zeros)
        ],
        out_specs=(batch_spec(IN), batch_spec(2 * LATENT_PAD)),
        compiler_params=pltpu.CompilerParams(
            dimension_semantics=("parallel",),   # v7x: shard batch over 2 TCs
            vmem_limit_bytes=VMEM_LIMIT,         # chip-adaptive (48 MiB / 30 MiB)
        ),
    )(x_in, w1b, b1, w2pb, b2p, w3pb, b3, w4b, b4, eps_in)

    mu = h2[:B, :LATENT]
    logvar = h2[:B, LATENT_PAD:LATENT_PAD + LATENT]
    return recon[:B], mu, logvar


def vae_reference(x, params, eps):
    """Pure-JAX f32 reference of the PyTorch forward (for correctness check)."""
    (w1, b1, w2, b2, w3, b3, w4, b4) = params
    x2d = x.reshape(-1, IN).astype(jnp.float32)
    h1 = jnp.maximum(x2d @ w1 + b1, 0.0)
    h = h1 @ w2 + b2
    mu, logvar = h[:, :LATENT], h[:, LATENT:]
    z = mu + eps * jnp.exp(0.5 * logvar)
    d1 = jnp.maximum(z @ w3 + b3, 0.0)
    logits = d1 @ w4 + b4
    return jax.nn.sigmoid(logits), mu, logvar


def init_params(key):
    """nn.Linear-style init U(-1/sqrt(fan_in), +1/sqrt(fan_in)).

    Weights stored as (in_features, out_features); biases as (1, out_features).
    """
    def linear(k, fan_in, fan_out):
        kw, kb = jax.random.split(k)
        bound = 1.0 / jnp.sqrt(float(fan_in))
        w = jax.random.uniform(kw, (fan_in, fan_out), jnp.float32, -bound, bound)
        b = jax.random.uniform(kb, (1, fan_out), jnp.float32, -bound, bound)
        return w, b

    k1, k2, k3, k4 = jax.random.split(key, 4)
    w1, b1 = linear(k1, IN, HID)           # encoder[0]
    w2, b2 = linear(k2, HID, 2 * LATENT)   # encoder[2]
    w3, b3 = linear(k3, LATENT, HID)       # decoder[0]
    w4, b4 = linear(k4, HID, IN)           # decoder[2]
    return (w1, b1, w2, b2, w3, b3, w4, b4)


if __name__ == "__main__":
    root = jax.random.PRNGKey(0)
    k_param, k_x, k_eps = jax.random.split(root, 3)

    params = init_params(k_param)
    packed = pack_params(params)           # one-time, outside the hot path

    # Small MNIST-like input: batch=2, NCHW (2, 1, 28, 28) -> view(-1, 784)
    x = jax.random.normal(k_x, (2, 1, 28, 28), dtype=jnp.float32)
    # eps ~ N(0, 1), same shape as mu/logvar/std (torch.randn_like(std))
    eps = jax.random.normal(k_eps, (2, LATENT), dtype=jnp.float32)

    recon, mu, logvar = jax.jit(vae_forward)(x, packed, eps)
    jax.block_until_ready((recon, mu, logvar))

    assert recon.shape == (2, IN) and mu.shape == (2, LATENT) and logvar.shape == (2, LATENT)
    assert bool(jnp.all(jnp.isfinite(recon.astype(jnp.float32))))
    assert bool(jnp.all(jnp.isfinite(mu))) and bool(jnp.all(jnp.isfinite(logvar)))
    # tanh-based sigmoid is exactly in [0, 1]
    assert bool(jnp.all((recon >= 0.0) & (recon <= 1.0)))

    # Compare against the f32 pure-JAX reference (bf16 matmuls / bf16 recon
    # output -> loose tolerance).
    r_ref, mu_ref, lv_ref = vae_reference(x, params, eps)
    assert bool(jnp.allclose(recon.astype(jnp.float32), r_ref, atol=5e-2, rtol=5e-2))
    assert bool(jnp.allclose(mu, mu_ref, atol=5e-2, rtol=5e-2))
    assert bool(jnp.allclose(logvar, lv_ref, atol=5e-2, rtol=5e-2))

    print("KERNEL_OK")
</pallas_src>

<mosaic_0001>
module attributes {stable_mosaic.version = 11 : i64} {
  func.func @_vae_kernel(%arg0: i32, %arg1: memref<16x784xbf16, #tpu.memory_space<vmem>>, %arg2: memref<784x400xbf16, #tpu.memory_space<vmem>>, %arg3: memref<1x400xf32, #tpu.memory_space<vmem>>, %arg4: memref<400x256xbf16, #tpu.memory_space<vmem>>, %arg5: memref<1x256xf32, #tpu.memory_space<vmem>>, %arg6: memref<128x400xbf16, #tpu.memory_space<vmem>>, %arg7: memref<1x400xf32, #tpu.memory_space<vmem>>, %arg8: memref<400x784xbf16, #tpu.memory_space<vmem>>, %arg9: memref<1x784xf32, #tpu.memory_space<vmem>>, %arg10: memref<16x128xf32, #tpu.memory_space<vmem>>, %arg11: memref<16x784xbf16, #tpu.memory_space<vmem>>, %arg12: memref<16x256xf32, #tpu.memory_space<vmem>>) attributes {dimension_semantics = [#tpu.dimension_semantics<parallel>], iteration_bounds = array<i64: 1>, scalar_prefetch = 0 : i64, scratch_operands = 0 : i64, tpu.core_type = #tpu.core_type<tc>, window_params = [{transform_indices = @transform_0, window_bounds = array<i64: 16, 784>}, {pipeline_mode = #tpu.pipeline_mode<synchronous>, transform_indices = @transform_1, window_bounds = array<i64: 784, 400>}, {pipeline_mode = #tpu.pipeline_mode<synchronous>, transform_indices = @transform_2, window_bounds = array<i64: 1, 400>}, {pipeline_mode = #tpu.pipeline_mode<synchronous>, transform_indices = @transform_3, window_bounds = array<i64: 400, 256>}, {pipeline_mode = #tpu.pipeline_mode<synchronous>, transform_indices = @transform_4, window_bounds = array<i64: 1, 256>}, {pipeline_mode = #tpu.pipeline_mode<synchronous>, transform_indices = @transform_5, window_bounds = array<i64: 128, 400>}, {pipeline_mode = #tpu.pipeline_mode<synchronous>, transform_indices = @transform_6, window_bounds = array<i64: 1, 400>}, {pipeline_mode = #tpu.pipeline_mode<synchronous>, transform_indices = @transform_7, window_bounds = array<i64: 400, 784>}, {pipeline_mode = #tpu.pipeline_mode<synchronous>, transform_indices = @transform_8, window_bounds = array<i64: 1, 784>}, {transform_indices = @transform_9, window_bounds = array<i64: 16, 128>}, {transform_indices = @transform_10, window_bounds = array<i64: 16, 784>}, {transform_indices = @transform_11, window_bounds = array<i64: 16, 256>}]} {
    %c0 = arith.constant 0 : index
    %c0_0 = arith.constant 0 : index
    %0 = vector.load %arg1[%c0, %c0_0] : memref<16x784xbf16, #tpu.memory_space<vmem>>, vector<16x784xbf16>
    %c0_1 = arith.constant 0 : index
    %c0_2 = arith.constant 0 : index
    %1 = vector.load %arg2[%c0_1, %c0_2] : memref<784x400xbf16, #tpu.memory_space<vmem>>, vector<784x400xbf16>
    %cst = arith.constant dense<0.000000e+00> : vector<16x400xf32>
    %2 = tpu.matmul %0, %1, %cst {dimension_numbers = #tpu.dot_dimension_numbers<[1], [0], [0], [1], [0, 0, 1, 1], [], []>} : vector<16x784xbf16>, vector<784x400xbf16>, vector<16x400xf32> -> vector<16x400xf32>
    %c0_3 = arith.constant 0 : index
    %c0_4 = arith.constant 0 : index
    %3 = vector.load %arg3[%c0_3, %c0_4] : memref<1x400xf32, #tpu.memory_space<vmem>>, vector<1x400xf32>
    %4 = vector.broadcast %3 : vector<1x400xf32> to vector<16x400xf32>
    %5 = arith.addf %2, %4 : vector<16x400xf32>
    %cst_5 = arith.constant 0.000000e+00 : f32
    %6 = vector.broadcast %cst_5 : f32 to vector<16x400xf32>
    %7 = arith.maximumf %5, %6 : vector<16x400xf32>
    %8 = arith.truncf %7 : vector<16x400xf32> to vector<16x400xbf16>
    %c0_6 = arith.constant 0 : index
    %c0_7 = arith.constant 0 : index
    %9 = vector.load %arg4[%c0_6, %c0_7] : memref<400x256xbf16, #tpu.memory_space<vmem>>, vector<400x256xbf16>
    %cst_8 = arith.constant dense<0.000000e+00> : vector<16x256xf32>
    %10 = tpu.matmul %8, %9, %cst_8 {dimension_numbers = #tpu.dot_dimension_numbers<[1], [0], [0], [1], [0, 0, 1, 1], [], []>} : vector<16x400xbf16>, vector<400x256xbf16>, vector<16x256xf32> -> vector<16x256xf32>
    %c0_9 = arith.constant 0 : index
    %c0_10 = arith.constant 0 : index
    %11 = vector.load %arg5[%c0_9, %c0_10] : memref<1x256xf32, #tpu.memory_space<vmem>>, vector<1x256xf32>
    %12 = vector.broadcast %11 : vector<1x256xf32> to vector<16x256xf32>
    %13 = arith.addf %10, %12 : vector<16x256xf32>
    %c0_11 = arith.constant 0 : index
    %c0_12 = arith.constant 0 : index
    %14 = vector.load %arg12[%c0_11, %c0_12] : memref<16x256xf32, #tpu.memory_space<vmem>>, vector<16x256xf32>
    tpu.vector_store %arg12[%c0_11, %c0_12], %13 {strides = array<i32>} : memref<16x256xf32, #tpu.memory_space<vmem>>, vector<16x256xf32>,
    %15 = vector.extract_strided_slice %13 {offsets = [0, 0], sizes = [16, 128], strides = [1, 1]} : vector<16x256xf32> to vector<16x128xf32>
    %16 = vector.extract_strided_slice %13 {offsets = [0, 128], sizes = [16, 128], strides = [1, 1]} : vector<16x256xf32> to vector<16x128xf32>
    %c0_13 = arith.constant 0 : index
    %c0_14 = arith.constant 0 : index
    %17 = vector.load %arg10[%c0_13, %c0_14] : memref<16x128xf32, #tpu.memory_space<vmem>>, vector<16x128xf32>
    %cst_15 = arith.constant 5.000000e-01 : f32
    %18 = vector.broadcast %cst_15 : f32 to vector<16x128xf32>
    %19 = arith.mulf %18, %16 : vector<16x128xf32>
    %20 = math.exp %19 : vector<16x128xf32>
    %21 = arith.mulf %17, %20 : vector<16x128xf32>
    %22 = arith.addf %15, %21 : vector<16x128xf32>
    %23 = arith.truncf %22 : vector<16x128xf32> to vector<16x128xbf16>
    %c0_16 = arith.constant 0 : index
    %c0_17 = arith.constant 0 : index
    %24 = vector.load %arg6[%c0_16, %c0_17] : memref<128x400xbf16, #tpu.memory_space<vmem>>, vector<128x400xbf16>
    %cst_18 = arith.constant dense<0.000000e+00> : vector<16x400xf32>
    %25 = tpu.matmul %23, %24, %cst_18 {dimension_numbers = #tpu.dot_dimension_numbers<[1], [0], [0], [1], [0, 0, 1, 1], [], []>} : vector<16x128xbf16>, vector<128x400xbf16>, vector<16x400xf32> -> vector<16x400xf32>
    %c0_19 = arith.constant 0 : index
    %c0_20 = arith.constant 0 : index
    %26 = vector.load %arg7[%c0_19, %c0_20] : memref<1x400xf32, #tpu.memory_space<vmem>>, vector<1x400xf32>
    %27 = vector.broadcast %26 : vector<1x400xf32> to vector<16x400xf32>
    %28 = arith.addf %25, %27 : vector<16x400xf32>
    %cst_21 = arith.constant 0.000000e+00 : f32
    %29 = vector.broadcast %cst_21 : f32 to vector<16x400xf32>
    %30 = arith.maximumf %28, %29 : vector<16x400xf32>
    %31 = arith.truncf %30 : vector<16x400xf32> to vector<16x400xbf16>
    %c0_22 = arith.constant 0 : index
    %c0_23 = arith.constant 0 : index
    %32 = vector.load %arg8[%c0_22, %c0_23] : memref<400x784xbf16, #tpu.memory_space<vmem>>, vector<400x784xbf16>
    %cst_24 = arith.constant dense<0.000000e+00> : vector<16x784xf32>
    %33 = tpu.matmul %31, %32, %cst_24 {dimension_numbers = #tpu.dot_dimension_numbers<[1], [0], [0], [1], [0, 0, 1, 1], [], []>} : vector<16x400xbf16>, vector<400x784xbf16>, vector<16x784xf32> -> vector<16x784xf32>
    %c0_25 = arith.constant 0 : index
    %c0_26 = arith.constant 0 : index
    %34 = vector.load %arg9[%c0_25, %c0_26] : memref<1x784xf32, #tpu.memory_space<vmem>>, vector<1x784xf32>
    %35 = vector.broadcast %34 : vector<1x784xf32> to vector<16x784xf32>
    %36 = arith.addf %33, %35 : vector<16x784xf32>
    %cst_27 = arith.constant 5.000000e-01 : f32
    %37 = vector.broadcast %cst_27 : f32 to vector<16x784xf32>
    %38 = arith.mulf %37, %36 : vector<16x784xf32>
    %39 = math.tanh %38 : vector<16x784xf32>
    %cst_28 = arith.constant 5.000000e-01 : f32
    %40 = vector.broadcast %cst_28 : f32 to vector<16x784xf32>
    %41 = arith.mulf %40, %39 : vector<16x784xf32>
    %cst_29 = arith.constant 5.000000e-01 : f32
    %42 = vector.broadcast %cst_29 : f32 to vector<16x784xf32>
    %43 = arith.addf %42, %41 : vector<16x784xf32>
    %44 = arith.truncf %43 : vector<16x784xf32> to vector<16x784xbf16>
    %c0_30 = arith.constant 0 : index
    %c0_31 = arith.constant 0 : index
    %45 = vector.load %arg11[%c0_30, %c0_31] : memref<16x784xbf16, #tpu.memory_space<vmem>>, vector<16x784xbf16>
    tpu.vector_store %arg11[%c0_30, %c0_31], %44 {strides = array<i32>} : memref<16x784xbf16, #tpu.memory_space<vmem>>, vector<16x784xbf16>,
    return
  }
  func.func @transform_0(%arg0: i32) -> (i32, i32) {
    %c0_i32 = arith.constant 0 : i32
    %c0_i32_0 = arith.constant 0 : i32
    return %arg0, %c0_i32 : i32, i32
  }
  func.func @transform_1(%arg0: i32) -> (i32, i32) {
    %c0_i32 = arith.constant 0 : i32
    %c0_i32_0 = arith.constant 0 : i32
    %c0_i32_1 = arith.constant 0 : i32
    return %c0_i32, %c0_i32_0 : i32, i32
  }
  func.func @transform_2(%arg0: i32) -> (i32, i32) {
    %c0_i32 = arith.constant 0 : i32
    %c0_i32_0 = arith.constant 0 : i32
    %c0_i32_1 = arith.constant 0 : i32
    return %c0_i32, %c0_i32_0 : i32, i32
  }
  func.func @transform_3(%arg0: i32) -> (i32, i32) {
    %c0_i32 = arith.constant 0 : i32
    %c0_i32_0 = arith.constant 0 : i32
    %c0_i32_1 = arith.constant 0 : i32
    return %c0_i32, %c0_i32_0 : i32, i32
  }
  func.func @transform_4(%arg0: i32) -> (i32, i32) {
    %c0_i32 = arith.constant 0 : i32
    %c0_i32_0 = arith.constant 0 : i32
    %c0_i32_1 = arith.constant 0 : i32
    return %c0_i32, %c0_i32_0 : i32, i32
  }
  func.func @transform_5(%arg0: i32) -> (i32, i32) {
    %c0_i32 = arith.constant 0 : i32
    %c0_i32_0 = arith.constant 0 : i32
    %c0_i32_1 = arith.constant 0 : i32
    return %c0_i32, %c0_i32_0 : i32, i32
  }
  func.func @transform_6(%arg0: i32) -> (i32, i32) {
    %c0_i32 = arith.constant 0 : i32
    %c0_i32_0 = arith.constant 0 : i32
    %c0_i32_1 = arith.constant 0 : i32
    return %c0_i32, %c0_i32_0 : i32, i32
  }
  func.func @transform_7(%arg0: i32) -> (i32, i32) {
    %c0_i32 = arith.constant 0 : i32
    %c0_i32_0 = arith.constant 0 : i32
    %c0_i32_1 = arith.constant 0 : i32
    return %c0_i32, %c0_i32_0 : i32, i32
  }
  func.func @transform_8(%arg0: i32) -> (i32, i32) {
    %c0_i32 = arith.constant 0 : i32
    %c0_i32_0 = arith.constant 0 : i32
    %c0_i32_1 = arith.constant 0 : i32
    return %c0_i32, %c0_i32_0 : i32, i32
  }
  func.func @transform_9(%arg0: i32) -> (i32, i32) {
    %c0_i32 = arith.constant 0 : i32
    %c0_i32_0 = arith.constant 0 : i32
    return %arg0, %c0_i32 : i32, i32
  }
  func.func @transform_10(%arg0: i32) -> (i32, i32) {
    %c0_i32 = arith.constant 0 : i32
    %c0_i32_0 = arith.constant 0 : i32
    return %arg0, %c0_i32 : i32, i32
  }
  func.func @transform_11(%arg0: i32) -> (i32, i32) {
    %c0_i32 = arith.constant 0 : i32
    %c0_i32_0 = arith.constant 0 : i32
    return %arg0, %c0_i32 : i32, i32
  }
}

</mosaic_0001>

<bundles_post_ra>
// kernel: vae_forward.1
= control target key start
LH: loop header
LB: loop body
LE: loop exit
PB: predicated region body
PF: predicated region fallthrough
CT: control target
= control target key end

     0   :  { %vm1279_vm0 = vcmask 130048   ;;  %vm3952_vm1 = vcmask 125952   ;;  %s6830_s1 = inlined_call_operand.vmem [shape: bf16[784,400], index: 1, kind: input, shape index: {}]   ;;  %s6831_s0 = inlined_call_operand.vmem [shape: bf16[16,784], index: 0, kind: input, shape index: {}]   ;;  %s6832_s3 = inlined_call_operand.vmem [shape: bf16[400,256], index: 3, kind: input, shape index: {}]   ;;  %s6833_s5 = inlined_call_operand.vmem [shape: bf16[128,400], index: 5, kind: input, shape index: {}]   ;;  %s6834_s2 = inlined_call_operand.vmem [shape: f32[1,400], index: 2, kind: input, shape index: {}]   ;;  %s6835_s7 = inlined_call_operand.vmem [shape: bf16[400,784], index: 7, kind: input, shape index: {}]   ;;  %s6836_s4 = inlined_call_operand.vmem [shape: f32[1,256], index: 4, kind: input, shape index: {}]   ;;  %s6837_s11 = inlined_call_operand.vmem [shape: f32[16,256], index: 11, kind: output, shape index: {1}]   ;;  %s6838_s9 = inlined_call_operand.vmem [shape: f32[16,128], index: 9, kind: input, shape index: {}]   ;;  %s6839_s6 = inlined_call_operand.vmem [shape: f32[1,400], index: 6, kind: input, shape index: {}]   ;;  %s6840_s8 = inlined_call_operand.vmem [shape: f32[1,784], index: 8, kind: input, shape index: {}]   ;;  %s6841_s10 = inlined_call_operand.vmem [shape: bf16[16,784], index: 10, kind: output, shape index: {0}]  }
   0x1   :  { %v4536_v0 = vld [vmem:[%s6830_s1 + $0x4] ss:$16 sps:$4 sm:$0xff]   ;;  %v4538_v1 = vld [vmem:[%s6830_s1 + $0xc] ss:$16 sps:$4 sm:$0xff]   ;;  %v4540_v2 = vld [vmem:[%s6830_s1] ss:$16 sps:$4 sm:$0xff]  }
   0x2   :  { %1283 = vmatprep.subr.bf16.mxu0 %v4536_v0  ;;  %v4541_v3 = vld [vmem:[%s6830_s1 + $0x8] ss:$16 sps:$4 sm:$0xff]   ;;  %1455 = vmatprep.subr.bf16.mxu1 %v4538_v1  ;;  %v4542_v4 = vld [vmem:[%s6830_s1 + $0x24] ss:$16 sps:$4 sm:$0xff]   ;;  %v4544_v5 = vld [vmem:[%s6830_s1 + $0x2c] ss:$16 sps:$4 sm:$0xff]  }
   0x3   :  { %1284 = vmatpush1.bf16.msra.mxu0 %v4540_v2  ;;  %1456 = vmatpush1.bf16.msra.mxu1 %v4541_v3  ;;  %v4546_v6 = vld [vmem:[%s6830_s1 + $0x20] ss:$16 sps:$4 sm:$0xff]   ;;  %v4547_v7 = vld [vmem:[%s6830_s1 + $0x28] ss:$16 sps:$4 sm:$0xff]   ;;  %v4548_v8 = vld [vmem:[%s6830_s1 + $0x44] ss:$16 sps:$4 sm:$0xff]  }
   0x4   :  { %1285 = vmatprep.subr.bf16.mxu0 %v4542_v4  ;;  %1457 = vmatprep.subr.bf16.mxu1 %v4544_v5  ;;  %v4550_v9 = vld [vmem:[%s6830_s1 + $0x4c] ss:$16 sps:$4 sm:$0xff]   ;;  %v4552_v10 = vld [vmem:[%s6830_s1 + $0x40] ss:$16 sps:$4 sm:$0xff]   ;;  %v4553_v11 = vld [vmem:[%s6830_s1 + $0x48] ss:$16 sps:$4 sm:$0xff]  }
   0x5   :  { %v4554_v12 = vld [vmem:[%s6830_s1 + $0x64] ss:$16 sps:$4 sm:$0xff]   ;;  %v4556_v13 = vld [vmem:[%s6830_s1 + $0x6c] ss:$16 sps:$4 sm:$0xff]   ;;  %v4558_v14 = vld [vmem:[%s6830_s1 + $0x60] ss:$16 sps:$4 sm:$0xff]  }
   0x6   :  { %v4559_v15 = vld [vmem:[%s6830_s1 + $0x68] ss:$16 sps:$4 sm:$0xff]   ;;  %v4560_v16 = vld [vmem:[%s6830_s1 + $0x84] ss:$16 sps:$4 sm:$0xff]   ;;  %v4562_v17 = vld [vmem:[%s6830_s1 + $0x8c] ss:$16 sps:$4 sm:$0xff]  }
   0x7   :  { %1286 = vmatpush1.bf16.msra.mxu0 %v4546_v6  ;;  %1458 = vmatpush1.bf16.msra.mxu1 %v4547_v7  ;;  %v4564_v18 = vld [vmem:[%s6830_s1 + $0x80] ss:$16 sps:$4 sm:$0xff]   ;;  %v4565_v19 = vld [vmem:[%s6830_s1 + $0x88] ss:$16 sps:$4 sm:$0xff]   ;;  %v4566_v20 = vld [vmem:[%s6830_s1 + $0xa4] ss:$16 sps:$4 sm:$0xff]  }
   0x8   :  { %1287 = vmatprep.subr.bf16.mxu0 %v4548_v8  ;;  %1459 = vmatprep.subr.bf16.mxu1 %v4550_v9  ;;  %v4568_v21 = vld [vmem:[%s6830_s1 + $0xac] ss:$16 sps:$4 sm:$0xff]   ;;  %v4570_v22 = vld [vmem:[%s6830_s1 + $0xa0] ss:$16 sps:$4 sm:$0xff]   ;;  %v4571_v23 = vld [vmem:[%s6830_s1 + $0xa8] ss:$16 sps:$4 sm:$0xff]  }
   0x9   :  { %v4572_v24 = vld [vmem:[%s6830_s1 + $0xc4] ss:$16 sps:$4 sm:$0xff]   ;;  %v4574_v25 = vld [vmem:[%s6830_s1 + $0xcc] ss:$16 sps:$4 sm:$0xff]   ;;  %v4576_v26 = vld [vmem:[%s6830_s1 + $0xc0] ss:$16 sps:$4 sm:$0xff]  }
   0xa   :  { %v4577_v27 = vld [vmem:[%s6830_s1 + $0xc8] ss:$16 sps:$4 sm:$0xff]   ;;  %v4578_v28 = vld [vmem:[%s6830_s1 + $0xe4] ss:$16 sps:$4 sm:$0xff]   ;;  %v4580_v29 = vld [vmem:[%s6830_s1 + $0xec] ss:$16 sps:$4 sm:$0xff]  }
   0xb   :  { %1288 = vmatpush1.bf16.msra.mxu0 %v4552_v10  ;;  %1460 = vmatpush1.bf16.msra.mxu1 %v4553_v11  ;;  %v4582_v30 = vld [vmem:[%s6830_s1 + $0xe0] ss:$16 sps:$4 sm:$0xff]   ;;  %v4583_v31 = vld [vmem:[%s6830_s1 + $0xe8] ss:$16 sps:$4 sm:$0xff]   ;;  %v4584_v32 = vld [vmem:[%s6830_s1 + $0x104] ss:$16 sps:$4 sm:$0xff]  }
   0xc   :  { %1289 = vmatprep.subr.bf16.mxu0 %v4554_v12  ;;  %1461 = vmatprep.subr.bf16.mxu1 %v4556_v13  ;;  %v4586_v33 = vld [vmem:[%s6830_s1 + $0x10c] ss:$16 sps:$4 sm:$0xff]   ;;  %v4588_v34 = vld [vmem:[%s6830_s1 + $0x100] ss:$16 sps:$4 sm:$0xff]   ;;  %v4589_v35 = vld [vmem:[%s6830_s1 + $0x108] ss:$16 sps:$4 sm:$0xff]  }
   0xd   :  { %v4590_v36 = vld [vmem:[%s6830_s1 + $0x124] ss:$16 sps:$4 sm:$0xff]   ;;  %v4592_v37 = vld [vmem:[%s6830_s1 + $0x12c] ss:$16 sps:$4 sm:$0xff]   ;;  %v4594_v38 = vld [vmem:[%s6830_s1 + $0x120] ss:$16 sps:$4 sm:$0xff]  }
   0xe   :  { %v4595_v39 = vld [vmem:[%s6830_s1 + $0x128] ss:$16 sps:$4 sm:$0xff]   ;;  %v4596_v40 = vld [vmem:[%s6830_s1 + $0x144] ss:$16 sps:$4 sm:$0xff]   ;;  %v4598_v41 = vld [vmem:[%s6830_s1 + $0x14c] ss:$16 sps:$4 sm:$0xff]  }
   0xf   :  { %1290 = vmatpush1.bf16.msra.mxu0 %v4558_v14  ;;  %1462 = vmatpush1.bf16.msra.mxu1 %v4559_v15  ;;  %v4600_v42 = vld [vmem:[%s6830_s1 + $0x140] ss:$16 sps:$4 sm:$0xff]   ;;  %v4601_v43 = vld [vmem:[%s6830_s1 + $0x148] ss:$16 sps:$4 sm:$0xff]   ;;  %v4602_v44 = vld [vmem:[%s6830_s1 + $0x164] ss:$16 sps:$4 sm:$0xff]  }
  0x10   :  { %1291 = vmatprep.subr.bf16.mxu0 %v4560_v16  ;;  %1463 = vmatprep.subr.bf16.mxu1 %v4562_v17  ;;  %v4604_v45 = vld [vmem:[%s6830_s1 + $0x16c] ss:$16 sps:$4 sm:$0xff]   ;;  %v4606_v46 = vld [vmem:[%s6830_s1 + $0x160] ss:$16 sps:$4 sm:$0xff]   ;;  %v4607_v47 = vld [vmem:[%s6830_s1 + $0x168] ss:$16 sps:$4 sm:$0xff]  }
  0x11   :  { %v4634_v48 = vld [vmem:[%s6831_s0 + $0x4] ss:$28 sps:$4 sm:$0xff]   ;;  %v4610_v50 = vld [vmem:[%s6830_s1 + $0x18c] ss:$16 sps:$4 sm:$0xff]   ;;  %v4613_v52 = vld [vmem:[%s6830_s1 + $0x188] ss:$16 sps:$4 sm:$0xff]  }
  0x12   :  { %v4608_v49 = vld [vmem:[%s6830_s1 + $0x184] ss:$16 sps:$4 sm:$0xff]   ;;  %1315 = vmatprep.mubr.bf16.mxu0 %v4634_v48  ;;  %1487 = vmatprep.mubr.bf16.mxu1 %v4634_v48  ;;  %v4612_v51 = vld [vmem:[%s6830_s1 + $0x180] ss:$16 sps:$4 sm:$0xff]   ;;  %v4616_v54 = vld [vmem:[%s6830_s1 + $0x1ac] ss:$16 sps:$4 sm:$0xff]  }
  0x13   :  { %1292 = vmatpush1.bf16.msra.mxu0 %v4564_v18  ;;  %1464 = vmatpush1.bf16.msra.mxu1 %v4565_v19  ;;  %v4614_v53 = vld [vmem:[%s6830_s1 + $0x1a4] ss:$16 sps:$4 sm:$0xff]   ;;  %v4618_v55 = vld [vmem:[%s6830_s1 + $0x1a0] ss:$16 sps:$4 sm:$0xff]   ;;  %v4619_v56 = vld [vmem:[%s6830_s1 + $0x1a8] ss:$16 sps:$4 sm:$0xff]  }
  0x14   :  { %1293 = vmatprep.subr.bf16.mxu0 %v4566_v20  ;;  %1465 = vmatprep.subr.bf16.mxu1 %v4568_v21  ;;  %v4620_v57 = vld [vmem:[%s6830_s1 + $0x1c4] ss:$16 sps:$4 sm:$0xff]   ;;  %v4622_v58 = vld [vmem:[%s6830_s1 + $0x1cc] ss:$16 sps:$4 sm:$0xff]   ;;  %v4624_v59 = vld [vmem:[%s6830_s1 + $0x1c0] ss:$16 sps:$4 sm:$0xff]  }
  0x15   :  { %v4625_v60 = vld [vmem:[%s6830_s1 + $0x1c8] ss:$16 sps:$4 sm:$0xff]   ;;  %v4626_v61 = vld [vmem:[%s6830_s1 + $0x1e4] ss:$16 sps:$4 sm:$0xff]   ;;  %v4628_v62 = vld [vmem:[%s6830_s1 + $0x1ec] ss:$16 sps:$4 sm:$0xff]  }
  0x16   :  { %v4630_v63 = vld [vmem:[%s6830_s1 + $0x1e0] ss:$16 sps:$4 sm:$0xff]   ;;  %v4631_v0 = vld [vmem:[%s6830_s1 + $0x1e8] ss:$16 sps:$4 sm:$0xff]   ;;  %v4637_v1 = vld [vmem:[%s6830_s1 + $0x204] ss:$16 sps:$4 sm:$0xff]  }
  0x17   :  { %1294 = vmatpush1.bf16.msra.mxu0 %v4570_v22  ;;  %1466 = vmatpush1.bf16.msra.mxu1 %v4571_v23  ;;  %v4640_v2 = vld [vmem:[%s6830_s1 + $0x20c] ss:$16 sps:$4 sm:$0xff]   ;;  %v4635_v4 = vld [vmem:[%s6830_s1 + $0x200] ss:$16 sps:$4 sm:$0xff]   ;;  %v4638_v5 = vld [vmem:[%s6830_s1 + $0x208] ss:$16 sps:$4 sm:$0xff]  }
  0x18   :  { %1295 = vmatprep.subr.bf16.mxu0 %v4572_v24  ;;  %1467 = vmatprep.subr.bf16.mxu1 %v4574_v25  ;;  %v4632_v3 = vld [vmem:[%s6831_s0] ss:$28 sps:$4 sm:$0xff]   ;;  %v4643_v6 = vld [vmem:[%s6830_s1 + $0x224] ss:$16 sps:$4 sm:$0xff]   ;;  %v4644_v9 = vld [vmem:[%s6830_s1 + $0x228] ss:$16 sps:$4 sm:$0xff]  }
  0x19   :  { %v4646_v7 = vld [vmem:[%s6830_s1 + $0x22c] ss:$16 sps:$4 sm:$0xff]   ;;  %v4641_v8 = vld [vmem:[%s6830_s1 + $0x220] ss:$16 sps:$4 sm:$0xff]   ;;  %v4649_v10 = vld [vmem:[%s6830_s1 + $0x244] ss:$16 sps:$4 sm:$0xff]  }
  0x1a   :  { %v4652_v11 = vld [vmem:[%s6830_s1 + $0x24c] ss:$16 sps:$4 sm:$0xff]   ;;  %v4647_v12 = vld [vmem:[%s6830_s1 + $0x240] ss:$16 sps:$4 sm:$0xff]   ;;  %v4650_v13 = vld [vmem:[%s6830_s1 + $0x248] ss:$16 sps:$4 sm:$0xff]  }
  0x1b   :  { %1296 = vmatpush1.bf16.msra.mxu0 %v4576_v26  ;;  %1468 = vmatpush1.bf16.msra.mxu1 %v4577_v27  ;;  %v4655_v14 = vld [vmem:[%s6830_s1 + $0x264] ss:$16 sps:$4 sm:$0xff]   ;;  %v4658_v15 = vld [vmem:[%s6830_s1 + $0x26c] ss:$16 sps:$4 sm:$0xff]   ;;  %v4653_v16 = vld [vmem:[%s6830_s1 + $0x260] ss:$16 sps:$4 sm:$0xff]  }
  0x1c   :  { %1297 = vmatprep.subr.bf16.mxu0 %v4578_v28  ;;  %1469 = vmatprep.subr.bf16.mxu1 %v4580_v29  ;;  %v4656_v17 = vld [vmem:[%s6830_s1 + $0x268] ss:$16 sps:$4 sm:$0xff]   ;;  %v4661_v18 = vld [vmem:[%s6830_s1 + $0x284] ss:$16 sps:$4 sm:$0xff]   ;;  %v4664_v19 = vld [vmem:[%s6830_s1 + $0x28c] ss:$16 sps:$4 sm:$0xff]  }
  0x1d   :  { %v4659_v20 = vld [vmem:[%s6830_s1 + $0x280] ss:$16 sps:$4 sm:$0xff]   ;;  %v4662_v21 = vld [vmem:[%s6830_s1 + $0x288] ss:$16 sps:$4 sm:$0xff]   ;;  %v4667_v22 = vld [vmem:[%s6830_s1 + $0x2a4] ss:$16 sps:$4 sm:$0xff]  }
  0x1e   :  { %v4670_v23 = vld [vmem:[%s6830_s1 + $0x2ac] ss:$16 sps:$4 sm:$0xff]   ;;  %v4665_v24 = vld [vmem:[%s6830_s1 + $0x2a0] ss:$16 sps:$4 sm:$0xff]   ;;  %v4668_v25 = vld [vmem:[%s6830_s1 + $0x2a8] ss:$16 sps:$4 sm:$0xff]  }
  0x1f   :  { %1298 = vmatpush1.bf16.msra.mxu0 %v4582_v30  ;;  %1470 = vmatpush1.bf16.msra.mxu1 %v4583_v31  ;;  %v4673_v26 = vld [vmem:[%s6830_s1 + $0x2c4] ss:$16 sps:$4 sm:$0xff]   ;;  %v4676_v27 = vld [vmem:[%s6830_s1 + $0x2cc] ss:$16 sps:$4 sm:$0xff]   ;;  %v4671_v28 = vld [vmem:[%s6830_s1 + $0x2c0] ss:$16 sps:$4 sm:$0xff]  }
  0x20   :  { %1299 = vmatprep.subr.bf16.mxu0 %v4584_v32  ;;  %1471 = vmatprep.subr.bf16.mxu1 %v4586_v33  ;;  %v4674_v29 = vld [vmem:[%s6830_s1 + $0x2c8] ss:$16 sps:$4 sm:$0xff]   ;;  %v4679_v31 = vld [vmem:[%s6830_s1 + $0x2e4] ss:$16 sps:$4 sm:$0xff]   ;;  %v4682_v32 = vld [vmem:[%s6830_s1 + $0x2ec] ss:$16 sps:$4 sm:$0xff]  }
  0x21   :  { %v4733_v30 = vld [vmem:[%s6831_s0 + $0xc] ss:$28 sps:$4 sm:$0xff]   ;;  %v4677_v33 = vld [vmem:[%s6830_s1 + $0x2e0] ss:$16 sps:$4 sm:$0xff]  }
  0x22   :  { %v4706_v48 = vld [vmem:[%s6830_s1 + $0x36c] ss:$16 sps:$4 sm:$0xff]  }
  0x23   :  { %1300 = vmatpush1.bf16.msra.mxu0 %v4588_v34  ;;  %1472 = vmatpush1.bf16.msra.mxu1 %v4589_v35  ;;  %v4680_v34 = vld [vmem:[%s6830_s1 + $0x2e8] ss:$16 sps:$4 sm:$0xff]   ;;  %v4685_v35 = vld [vmem:[%s6830_s1 + $0x304] ss:$16 sps:$4 sm:$0xff]  }
  0x24   :  { %1301 = vmatprep.subr.bf16.mxu0 %v4590_v36  ;;  %1473 = vmatprep.subr.bf16.mxu1 %v4592_v37  ;;  %v4688_v36 = vld [vmem:[%s6830_s1 + $0x30c] ss:$16 sps:$4 sm:$0xff]   ;;  %v4683_v37 = vld [vmem:[%s6830_s1 + $0x300] ss:$16 sps:$4 sm:$0xff]  }
  0x27   :  { %1302 = vmatpush1.bf16.msra.mxu0 %v4594_v38  ;;  %1474 = vmatpush1.bf16.msra.mxu1 %v4595_v39  ;;  %v4686_v38 = vld [vmem:[%s6830_s1 + $0x308] ss:$16 sps:$4 sm:$0xff]   ;;  %v4691_v39 = vld [vmem:[%s6830_s1 + $0x324] ss:$16 sps:$4 sm:$0xff]  }
  0x28   :  { %1303 = vmatprep.subr.bf16.mxu0 %v4596_v40  ;;  %1475 = vmatprep.subr.bf16.mxu1 %v4598_v41  ;;  %v4694_v40 = vld [vmem:[%s6830_s1 + $0x32c] ss:$16 sps:$4 sm:$0xff]   ;;  %v4689_v41 = vld [vmem:[%s6830_s1 + $0x320] ss:$16 sps:$4 sm:$0xff]  }
  0x2b   :  { %1304 = vmatpush1.bf16.msra.mxu0 %v4600_v42  ;;  %1476 = vmatpush1.bf16.msra.mxu1 %v4601_v43  ;;  %v4692_v42 = vld [vmem:[%s6830_s1 + $0x328] ss:$16 sps:$4 sm:$0xff]   ;;  %v4697_v43 = vld [vmem:[%s6830_s1 + $0x344] ss:$16 sps:$4 sm:$0xff]  }
  0x2c   :  { %1305 = vmatprep.subr.bf16.mxu0 %v4602_v44  ;;  %1477 = vmatprep.subr.bf16.mxu1 %v4604_v45  ;;  %v4700_v44 = vld [vmem:[%s6830_s1 + $0x34c] ss:$16 sps:$4 sm:$0xff]   ;;  %v4695_v45 = vld [vmem:[%s6830_s1 + $0x340] ss:$16 sps:$4 sm:$0xff]  }
  0x2f   :  { %1306 = vmatpush1.bf16.msra.mxu0 %v4606_v46  ;;  %1478 = vmatpush1.bf16.msra.mxu1 %v4607_v47  ;;  %v4698_v46 = vld [vmem:[%s6830_s1 + $0x348] ss:$16 sps:$4 sm:$0xff]   ;;  %v4703_v47 = vld [vmem:[%s6830_s1 + $0x364] ss:$16 sps:$4 sm:$0xff]  }
  0x30   :  { %1307 = vmatprep.subr.bf16.mxu0 %v4608_v49  ;;  %1479 = vmatprep.subr.bf16.mxu1 %v4610_v50  ;;  %v4701_v49 = vld [vmem:[%s6830_s1 + $0x360] ss:$16 sps:$4 sm:$0xff]   ;;  %v4704_v50 = vld [vmem:[%s6830_s1 + $0x368] ss:$16 sps:$4 sm:$0xff]  }
  0x33   :  { %1308 = vmatpush1.bf16.msra.mxu0 %v4612_v51  ;;  %1480 = vmatpush1.bf16.msra.mxu1 %v4613_v52  ;;  %v4709_v51 = vld [vmem:[%s6830_s1 + $0x384] ss:$16 sps:$4 sm:$0xff]   ;;  %v4712_v52 = vld [vmem:[%s6830_s1 + $0x38c] ss:$16 sps:$4 sm:$0xff]  }
  0x34   :  { %1309 = vmatprep.subr.bf16.mxu0 %v4614_v53  ;;  %1481 = vmatprep.subr.bf16.mxu1 %v4616_v54  ;;  %v4707_v53 = vld [vmem:[%s6830_s1 + $0x380] ss:$16 sps:$4 sm:$0xff]   ;;  %v4710_v54 = vld [vmem:[%s6830_s1 + $0x388] ss:$16 sps:$4 sm:$0xff]  }
  0x37   :  { %1310 = vmatpush1.bf16.msra.mxu0 %v4618_v55  ;;  %1482 = vmatpush1.bf16.msra.mxu1 %v4619_v56  ;;  %v4715_v55 = vld [vmem:[%s6830_s1 + $0x3a4] ss:$16 sps:$4 sm:$0xff]   ;;  %v4718_v56 = vld [vmem:[%s6830_s1 + $0x3ac] ss:$16 sps:$4 sm:$0xff]  }
  0x38   :  { %1311 = vmatprep.subr.bf16.mxu0 %v4620_v57  ;;  %1483 = vmatprep.subr.bf16.mxu1 %v4622_v58  ;;  %v4713_v57 = vld [vmem:[%s6830_s1 + $0x3a0] ss:$16 sps:$4 sm:$0xff]   ;;  %v4716_v58 = vld [vmem:[%s6830_s1 + $0x3a8] ss:$16 sps:$4 sm:$0xff]  }
  0x3b   :  { %1312 = vmatpush1.bf16.msra.mxu0 %v4624_v59  ;;  %1484 = vmatpush1.bf16.msra.mxu1 %v4625_v60  ;;  %v4721_v59 = vld [vmem:[%s6830_s1 + $0x3c4] ss:$16 sps:$4 sm:$0xff]   ;;  %v4724_v60 = vld [vmem:[%s6830_s1 + $0x3cc] ss:$16 sps:$4 sm:$0xff]  }
  0x3c   :  { %1313 = vmatprep.subr.bf16.mxu0 %v4626_v61  ;;  %1485 = vmatprep.subr.bf16.mxu1 %v4628_v62  ;;  %v4719_v61 = vld [vmem:[%s6830_s1 + $0x3c0] ss:$16 sps:$4 sm:$0xff]   ;;  %v4722_v62 = vld [vmem:[%s6830_s1 + $0x3c8] ss:$16 sps:$4 sm:$0xff]  }
  0x3f   :  { %1314 = vmatpush1.bf16.msra.mxu0 %v4630_v63  ;;  %1486 = vmatpush1.bf16.msra.mxu1 %v4631_v0  ;;  %v4727_v63 = vld [vmem:[%s6830_s1 + $0x3e4] ss:$16 sps:$4 sm:$0xff]   ;;  %v4730_v0 = vld [vmem:[%s6830_s1 + $0x3ec] ss:$16 sps:$4 sm:$0xff]  }
  0x40   :  { %1326 = vmatprep.subr.bf16.mxu0 %v4637_v1  ;;  %1498 = vmatprep.subr.bf16.mxu1 %v4640_v2  ;;  %v4725_v1 = vld [vmem:[%s6830_s1 + $0x3e0] ss:$16 sps:$4 sm:$0xff]   ;;  %v4728_v2 = vld [vmem:[%s6830_s1 + $0x3e8] ss:$16 sps:$4 sm:$0xff]  }
  0x42   :  { %1316 = vmatmul.mubr.bf16.vlgmr.msra.gmra.mrb[0].mxu0 %v4632_v3  ;;  %1488 = vmatmul.mubr.bf16.vlgmr.msra.gmra.mrb[0].mxu1 %v4632_v3  ;;  %v4736_v3 = vld [vmem:[%s6830_s1 + $0x404] ss:$16 sps:$4 sm:$0xff]  }
  0x43   :  { %1327 = vmatpush1.bf16.msra.mxu0 %v4635_v4  ;;  %1499 = vmatpush1.bf16.msra.mxu1 %v4638_v5  ;;  %v4739_v4 = vld [vmem:[%s6830_s1 + $0x40c] ss:$16 sps:$4 sm:$0xff]   ;;  %v4731_v5 = vld [vmem:[%s6831_s0 + $0x8] ss:$28 sps:$4 sm:$0xff]  }
  0x44   :  { %1328 = vmatprep.subr.bf16.mxu0 %v4643_v6  ;;  %1500 = vmatprep.subr.bf16.mxu1 %v4646_v7  ;;  %v4734_v6 = vld [vmem:[%s6830_s1 + $0x400] ss:$16 sps:$4 sm:$0xff]   ;;  %v4737_v7 = vld [vmem:[%s6830_s1 + $0x408] ss:$16 sps:$4 sm:$0xff]  }
  0x45   :  { %1358 = vmatprep.mubr.bf16.mxu0 %v4733_v30  ;;  %1530 = vmatprep.mubr.bf16.mxu1 %v4733_v30  ;;  %v4775_v30 = vld [vmem:[%s6830_s1 + $0x4cc] ss:$16 sps:$4 sm:$0xff]  }
  0x47   :  { %1329 = vmatpush1.bf16.msra.mxu0 %v4641_v8  ;;  %1501 = vmatpush1.bf16.msra.mxu1 %v4644_v9  ;;  %v4742_v8 = vld [vmem:[%s6830_s1 + $0x424] ss:$16 sps:$4 sm:$0xff]   ;;  %v4745_v9 = vld [vmem:[%s6830_s1 + $0x42c] ss:$16 sps:$4 sm:$0xff]  }
  0x48   :  { %1330 = vmatprep.subr.bf16.mxu0 %v4649_v10  ;;  %1502 = vmatprep.subr.bf16.mxu1 %v4652_v11  ;;  %v4740_v10 = vld [vmem:[%s6830_s1 + $0x420] ss:$16 sps:$4 sm:$0xff]   ;;  %v4743_v11 = vld [vmem:[%s6830_s1 + $0x428] ss:$16 sps:$4 sm:$0xff]  }
  0x4b   :  { %1331 = vmatpush1.bf16.msra.mxu0 %v4647_v12  ;;  %1503 = vmatpush1.bf16.msra.mxu1 %v4650_v13  ;;  %v4832_v12 = vld [vmem:[%s6831_s0 + $0x14] ss:$28 sps:$4 sm:$0xff]  }
  0x4c   :  { %1332 = vmatprep.subr.bf16.mxu0 %v4655_v14  ;;  %1504 = vmatprep.subr.bf16.mxu1 %v4658_v15  ;;  %v4748_v13 = vld [vmem:[%s6830_s1 + $0x444] ss:$16 sps:$4 sm:$0xff]   ;;  %v4751_v14 = vld [vmem:[%s6830_s1 + $0x44c] ss:$16 sps:$4 sm:$0xff]   ;;  %v4746_v15 = vld [vmem:[%s6830_s1 + $0x440] ss:$16 sps:$4 sm:$0xff]  }
  0x4f   :  { %1333 = vmatpush1.bf16.msra.mxu0 %v4653_v16  ;;  %1505 = vmatpush1.bf16.msra.mxu1 %v4656_v17  ;;  %v4749_v16 = vld [vmem:[%s6830_s1 + $0x448] ss:$16 sps:$4 sm:$0xff]   ;;  %v4754_v17 = vld [vmem:[%s6830_s1 + $0x464] ss:$16 sps:$4 sm:$0xff]  }
  0x50   :  { %1334 = vmatprep.subr.bf16.mxu0 %v4661_v18  ;;  %1506 = vmatprep.subr.bf16.mxu1 %v4664_v19  ;;  %v4757_v18 = vld [vmem:[%s6830_s1 + $0x46c] ss:$16 sps:$4 sm:$0xff]   ;;  %v4752_v19 = vld [vmem:[%s6830_s1 + $0x460] ss:$16 sps:$4 sm:$0xff]  }
  0x53   :  { %1335 = vmatpush1.bf16.msra.mxu0 %v4659_v20  ;;  %1507 = vmatpush1.bf16.msra.mxu1 %v4662_v21  ;;  %v4755_v20 = vld [vmem:[%s6830_s1 + $0x468] ss:$16 sps:$4 sm:$0xff]   ;;  %v4760_v21 = vld [vmem:[%s6830_s1 + $0x484] ss:$16 sps:$4 sm:$0xff]  }
  0x54   :  { %1336 = vmatprep.subr.bf16.mxu0 %v4667_v22  ;;  %1508 = vmatprep.subr.bf16.mxu1 %v4670_v23  ;;  %v4763_v22 = vld [vmem:[%s6830_s1 + $0x48c] ss:$16 sps:$4 sm:$0xff]   ;;  %v4758_v23 = vld [vmem:[%s6830_s1 + $0x480] ss:$16 sps:$4 sm:$0xff]  }
  0x57   :  { %1337 = vmatpush1.bf16.msra.mxu0 %v4665_v24  ;;  %1509 = vmatpush1.bf16.msra.mxu1 %v4668_v25  ;;  %v4761_v24 = vld [vmem:[%s6830_s1 + $0x488] ss:$16 sps:$4 sm:$0xff]   ;;  %v4766_v25 = vld [vmem:[%s6830_s1 + $0x4a4] ss:$16 sps:$4 sm:$0xff]  }
  0x58   :  { %1338 = vmatprep.subr.bf16.mxu0 %v4673_v26  ;;  %1510 = vmatprep.subr.bf16.mxu1 %v4676_v27  ;;  %v4769_v26 = vld [vmem:[%s6830_s1 + $0x4ac] ss:$16 sps:$4 sm:$0xff]   ;;  %v4764_v27 = vld [vmem:[%s6830_s1 + $0x4a0] ss:$16 sps:$4 sm:$0xff]  }
  0x5b   :  { %1339 = vmatpush1.bf16.msra.mxu0 %v4671_v28  ;;  %1511 = vmatpush1.bf16.msra.mxu1 %v4674_v29  ;;  %v4767_v28 = vld [vmem:[%s6830_s1 + $0x4a8] ss:$16 sps:$4 sm:$0xff]   ;;  %v4772_v29 = vld [vmem:[%s6830_s1 + $0x4c4] ss:$16 sps:$4 sm:$0xff]  }
  0x5c   :  { %1340 = vmatprep.subr.bf16.mxu0 %v4679_v31  ;;  %1512 = vmatprep.subr.bf16.mxu1 %v4682_v32  ;;  %v4770_v31 = vld [vmem:[%s6830_s1 + $0x4c0] ss:$16 sps:$4 sm:$0xff]   ;;  %v4773_v32 = vld [vmem:[%s6830_s1 + $0x4c8] ss:$16 sps:$4 sm:$0xff]  }
  0x5f   :  { %1341 = vmatpush1.bf16.msra.mxu0 %v4677_v33  ;;  %1513 = vmatpush1.bf16.msra.mxu1 %v4680_v34  ;;  %v4778_v33 = vld [vmem:[%s6830_s1 + $0x4e4] ss:$16 sps:$4 sm:$0xff]   ;;  %v4781_v34 = vld [vmem:[%s6830_s1 + $0x4ec] ss:$16 sps:$4 sm:$0xff]  }
  0x60   :  { %1342 = vmatprep.subr.bf16.mxu0 %v4685_v35  ;;  %1514 = vmatprep.subr.bf16.mxu1 %v4688_v36  ;;  %v4776_v35 = vld [vmem:[%s6830_s1 + $0x4e0] ss:$16 sps:$4 sm:$0xff]   ;;  %v4779_v36 = vld [vmem:[%s6830_s1 + $0x4e8] ss:$16 sps:$4 sm:$0xff]  }
  0x63   :  { %1343 = vmatpush1.bf16.msra.mxu0 %v4683_v37  ;;  %1515 = vmatpush1.bf16.msra.mxu1 %v4686_v38  ;;  %v4784_v37 = vld [vmem:[%s6830_s1 + $0x504] ss:$16 sps:$4 sm:$0xff]   ;;  %v4787_v38 = vld [vmem:[%s6830_s1 + $0x50c] ss:$16 sps:$4 sm:$0xff]  }
  0x64   :  { %1344 = vmatprep.subr.bf16.mxu0 %v4691_v39  ;;  %1516 = vmatprep.subr.bf16.mxu1 %v4694_v40  ;;  %v4782_v39 = vld [vmem:[%s6830_s1 + $0x500] ss:$16 sps:$4 sm:$0xff]   ;;  %v4785_v40 = vld [vmem:[%s6830_s1 + $0x508] ss:$16 sps:$4 sm:$0xff]  }
  0x67   :  { %1345 = vmatpush1.bf16.msra.mxu0 %v4689_v41  ;;  %1517 = vmatpush1.bf16.msra.mxu1 %v4692_v42  ;;  %v4790_v41 = vld [vmem:[%s6830_s1 + $0x524] ss:$16 sps:$4 sm:$0xff]   ;;  %v4793_v42 = vld [vmem:[%s6830_s1 + $0x52c] ss:$16 sps:$4 sm:$0xff]  }
  0x68   :  { %1346 = vmatprep.subr.bf16.mxu0 %v4697_v43  ;;  %1518 = vmatprep.subr.bf16.mxu1 %v4700_v44  ;;  %v4788_v43 = vld [vmem:[%s6830_s1 + $0x520] ss:$16 sps:$4 sm:$0xff]   ;;  %v4791_v44 = vld [vmem:[%s6830_s1 + $0x528] ss:$16 sps:$4 sm:$0xff]  }
  0x6b   :  { %1347 = vmatpush1.bf16.msra.mxu0 %v4695_v45  ;;  %1519 = vmatpush1.bf16.msra.mxu1 %v4698_v46  ;;  %v4796_v45 = vld [vmem:[%s6830_s1 + $0x544] ss:$16 sps:$4 sm:$0xff]   ;;  %v4799_v46 = vld [vmem:[%s6830_s1 + $0x54c] ss:$16 sps:$4 sm:$0xff]  }
  0x6c   :  { %1348 = vmatprep.subr.bf16.mxu0 %v4703_v47  ;;  %1520 = vmatprep.subr.bf16.mxu1 %v4706_v48  ;;  %v4794_v47 = vld [vmem:[%s6830_s1 + $0x540] ss:$16 sps:$4 sm:$0xff]   ;;  %v4797_v48 = vld [vmem:[%s6830_s1 + $0x548] ss:$16 sps:$4 sm:$0xff]  }
  0x6f   :  { %1349 = vmatpush1.bf16.msra.mxu0 %v4701_v49  ;;  %1521 = vmatpush1.bf16.msra.mxu1 %v4704_v50  ;;  %v4802_v49 = vld [vmem:[%s6830_s1 + $0x564] ss:$16 sps:$4 sm:$0xff]   ;;  %v4805_v50 = vld [vmem:[%s6830_s1 + $0x56c] ss:$16 sps:$4 sm:$0xff]  }
  0x70   :  { %1350 = vmatprep.subr.bf16.mxu0 %v4709_v51  ;;  %1522 = vmatprep.subr.bf16.mxu1 %v4712_v52  ;;  %v4800_v51 = vld [vmem:[%s6830_s1 + $0x560] ss:$16 sps:$4 sm:$0xff]   ;;  %v4803_v52 = vld [vmem:[%s6830_s1 + $0x568] ss:$16 sps:$4 sm:$0xff]  }
  0x73   :  { %1351 = vmatpush1.bf16.msra.mxu0 %v4707_v53  ;;  %1523 = vmatpush1.bf16.msra.mxu1 %v4710_v54  ;;  %v4808_v53 = vld [vmem:[%s6830_s1 + $0x584] ss:$16 sps:$4 sm:$0xff]   ;;  %v4811_v54 = vld [vmem:[%s6830_s1 + $0x58c] ss:$16 sps:$4 sm:$0xff]  }
  0x74   :  { %1352 = vmatprep.subr.bf16.mxu0 %v4715_v55  ;;  %1524 = vmatprep.subr.bf16.mxu1 %v4718_v56  ;;  %v4806_v55 = vld [vmem:[%s6830_s1 + $0x580] ss:$16 sps:$4 sm:$0xff]   ;;  %v4809_v56 = vld [vmem:[%s6830_s1 + $0x588] ss:$16 sps:$4 sm:$0xff]  }
  0x77   :  { %1353 = vmatpush1.bf16.msra.mxu0 %v4713_v57  ;;  %1525 = vmatpush1.bf16.msra.mxu1 %v4716_v58  ;;  %v4814_v57 = vld [vmem:[%s6830_s1 + $0x5a4] ss:$16 sps:$4 sm:$0xff]   ;;  %v4817_v58 = vld [vmem:[%s6830_s1 + $0x5ac] ss:$16 sps:$4 sm:$0xff]  }
  0x78   :  { %1354 = vmatprep.subr.bf16.mxu0 %v4721_v59  ;;  %1526 = vmatprep.subr.bf16.mxu1 %v4724_v60  ;;  %v4812_v59 = vld [vmem:[%s6830_s1 + $0x5a0] ss:$16 sps:$4 sm:$0xff]   ;;  %v4815_v60 = vld [vmem:[%s6830_s1 + $0x5a8] ss:$16 sps:$4 sm:$0xff]  }
  0x7b   :  { %1355 = vmatpush1.bf16.msra.mxu0 %v4719_v61  ;;  %1527 = vmatpush1.bf16.msra.mxu1 %v4722_v62  ;;  %v4820_v61 = vld [vmem:[%s6830_s1 + $0x5c4] ss:$16 sps:$4 sm:$0xff]   ;;  %v4823_v62 = vld [vmem:[%s6830_s1 + $0x5cc] ss:$16 sps:$4 sm:$0xff]  }
  0x7c   :  { %1356 = vmatprep.subr.bf16.mxu0 %v4727_v63  ;;  %1528 = vmatprep.subr.bf16.mxu1 %v4730_v0  ;;  %v4818_v63 = vld [vmem:[%s6830_s1 + $0x5c0] ss:$16 sps:$4 sm:$0xff]   ;;  %v4821_v0 = vld [vmem:[%s6830_s1 + $0x5c8] ss:$16 sps:$4 sm:$0xff]  }
  0x7f   :  { %1357 = vmatpush1.bf16.msra.mxu0 %v4725_v1  ;;  %1529 = vmatpush1.bf16.msra.mxu1 %v4728_v2  ;;  %v4826_v1 = vld [vmem:[%s6830_s1 + $0x5e4] ss:$16 sps:$4 sm:$0xff]   ;;  %v4829_v2 = vld [vmem:[%s6830_s1 + $0x5ec] ss:$16 sps:$4 sm:$0xff]  }
  0x80   :  { %1369 = vmatprep.subr.bf16.mxu0 %v4736_v3  ;;  %1541 = vmatprep.subr.bf16.mxu1 %v4739_v4  ;;  %v4824_v3 = vld [vmem:[%s6830_s1 + $0x5e0] ss:$16 sps:$4 sm:$0xff]   ;;  %v4827_v4 = vld [vmem:[%s6830_s1 + $0x5e8] ss:$16 sps:$4 sm:$0xff]  }
  0x82   :  { %1359 = vmatmul.mubr.bf16.vlgmr.msra.gmra.mrb[0].mxu0 %v4731_v5  ;;  %1531 = vmatmul.mubr.bf16.vlgmr.msra.gmra.mrb[0].mxu1 %v4731_v5  ;;  %v4835_v5 = vld [vmem:[%s6830_s1 + $0x604] ss:$16 sps:$4 sm:$0xff]  }
  0x83   :  { %1370 = vmatpush1.bf16.msra.mxu0 %v4734_v6  ;;  %1542 = vmatpush1.bf16.msra.mxu1 %v4737_v7  ;;  %v4838_v6 = vld [vmem:[%s6830_s1 + $0x60c] ss:$16 sps:$4 sm:$0xff]  }
  0x84   :  { %1371 = vmatprep.subr.bf16.mxu0 %v4742_v8  ;;  %1543 = vmatprep.subr.bf16.mxu1 %v4745_v9  ;;  %v4830_v7 = vld [vmem:[%s6831_s0 + $0x10] ss:$28 sps:$4 sm:$0xff]   ;;  %v4836_v9 = vld [vmem:[%s6830_s1 + $0x608] ss:$16 sps:$4 sm:$0xff]  }
  0x85   :  { %1401 = vmatprep.mubr.bf16.mxu0 %v4832_v12  ;;  %1573 = vmatprep.mubr.bf16.mxu1 %v4832_v12  ;;  %v4833_v8 = vld [vmem:[%s6830_s1 + $0x600] ss:$16 sps:$4 sm:$0xff]   ;;  %v4839_v12 = vld [vmem:[%s6831_s0 + $0x18] ss:$28 sps:$4 sm:$0xff]  }
  0x87   :  { %1372 = vmatpush1.bf16.msra.mxu0 %v4740_v10  ;;  %1544 = vmatpush1.bf16.msra.mxu1 %v4743_v11  ;;  %v4842_v10 = vld [vmem:[%s6832_s3 + $0x4] ss:$8 sps:$4 sm:$0xff]   ;;  %v5245_v11 = vmov 0  }
  0x88   :  { %1373 = vmatprep.subr.bf16.mxu0 %v4748_v13  ;;  %1545 = vmatprep.subr.bf16.mxu1 %v4751_v14  ;;  %v4840_v13 = vld [vmem:[%s6832_s3] ss:$8 sps:$4 sm:$0xff]   ;;  %v4845_v14 = vld [vmem:[%s6832_s3 + $0x14] ss:$8 sps:$4 sm:$0xff]  }
  0x8b   :  { %1374 = vmatpush1.bf16.msra.mxu0 %v4746_v15  ;;  %1546 = vmatpush1.bf16.msra.mxu1 %v4749_v16  ;;  %v4843_v15 = vld [vmem:[%s6832_s3 + $0x10] ss:$8 sps:$4 sm:$0xff]   ;;  %v4848_v16 = vld [vmem:[%s6832_s3 + $0x24] ss:$8 sps:$4 sm:$0xff]  }
  0x8c   :  { %1375 = vmatprep.subr.bf16.mxu0 %v4754_v17  ;;  %1547 = vmatprep.subr.bf16.mxu1 %v4757_v18  ;;  %v4846_v17 = vld [vmem:[%s6832_s3 + $0x20] ss:$8 sps:$4 sm:$0xff]   ;;  %v4851_v18 = vld [vmem:[%s6832_s3 + $0x34] ss:$8 sps:$4 sm:$0xff]  }
  0x8f   :  { %1376 = vmatpush1.bf16.msra.mxu0 %v4752_v19  ;;  %1548 = vmatpush1.bf16.msra.mxu1 %v4755_v20  ;;  %v4849_v19 = vld [vmem:[%s6832_s3 + $0x30] ss:$8 sps:$4 sm:$0xff]   ;;  %v4854_v20 = vld [vmem:[%s6832_s3 + $0x44] ss:$8 sps:$4 sm:$0xff]  }
  0x90   :  { %1377 = vmatprep.subr.bf16.mxu0 %v4760_v21  ;;  %1549 = vmatprep.subr.bf16.mxu1 %v4763_v22  ;;  %v4852_v21 = vld [vmem:[%s6832_s3 + $0x40] ss:$8 sps:$4 sm:$0xff]   ;;  %v4857_v22 = vld [vmem:[%s6832_s3 + $0x54] ss:$8 sps:$4 sm:$0xff]  }
  0x93   :  { %1378 = vmatpush1.bf16.msra.mxu0 %v4758_v23  ;;  %1550 = vmatpush1.bf16.msra.mxu1 %v4761_v24  ;;  %v4855_v23 = vld [vmem:[%s6832_s3 + $0x50] ss:$8 sps:$4 sm:$0xff]   ;;  %v4860_v24 = vld [vmem:[%s6832_s3 + $0x64] ss:$8 sps:$4 sm:$0xff]  }
  0x94   :  { %1379 = vmatprep.subr.bf16.mxu0 %v4766_v25  ;;  %1551 = vmatprep.subr.bf16.mxu1 %v4769_v26  ;;  %v4858_v25 = vld [vmem:[%s6832_s3 + $0x60] ss:$8 sps:$4 sm:$0xff]   ;;  %v4863_v26 = vld [vmem:[%s6832_s3 + $0x74] ss:$8 sps:$4 sm:$0xff]  }
  0x97   :  { %1380 = vmatpush1.bf16.msra.mxu0 %v4764_v27  ;;  %1552 = vmatpush1.bf16.msra.mxu1 %v4767_v28  ;;  %v4861_v27 = vld [vmem:[%s6832_s3 + $0x70] ss:$8 sps:$4 sm:$0xff]   ;;  %v4866_v28 = vld [vmem:[%s6832_s3 + $0x84] ss:$8 sps:$4 sm:$0xff]  }
  0x98   :  { %1381 = vmatprep.subr.bf16.mxu0 %v4772_v29  ;;  %1553 = vmatprep.subr.bf16.mxu1 %v4775_v30  ;;  %v4864_v29 = vld [vmem:[%s6832_s3 + $0x80] ss:$8 sps:$4 sm:$0xff]   ;;  %v4869_v30 = vld [vmem:[%s6832_s3 + $0x94] ss:$8 sps:$4 sm:$0xff]  }
  0x9b   :  { %1382 = vmatpush1.bf16.msra.mxu0 %v4770_v31  ;;  %1554 = vmatpush1.bf16.msra.mxu1 %v4773_v32  ;;  %v4867_v31 = vld [vmem:[%s6832_s3 + $0x90] ss:$8 sps:$4 sm:$0xff]   ;;  %v4872_v32 = vld [vmem:[%s6832_s3 + $0xa4] ss:$8 sps:$4 sm:$0xff]  }
  0x9c   :  { %1383 = vmatprep.subr.bf16.mxu0 %v4778_v33  ;;  %1555 = vmatprep.subr.bf16.mxu1 %v4781_v34  ;;  %v4870_v33 = vld [vmem:[%s6832_s3 + $0xa0] ss:$8 sps:$4 sm:$0xff]   ;;  %v4875_v34 = vld [vmem:[%s6832_s3 + $0xb4] ss:$8 sps:$4 sm:$0xff]  }
  0x9f   :  { %1384 = vmatpush1.bf16.msra.mxu0 %v4776_v35  ;;  %1556 = vmatpush1.bf16.msra.mxu1 %v4779_v36  ;;  %v4873_v35 = vld [vmem:[%s6832_s3 + $0xb0] ss:$8 sps:$4 sm:$0xff]   ;;  %v4878_v36 = vld [vmem:[%s6832_s3 + $0xc4] ss:$8 sps:$4 sm:$0xff]  }
  0xa0   :  { %1385 = vmatprep.subr.bf16.mxu0 %v4784_v37  ;;  %1557 = vmatprep.subr.bf16.mxu1 %v4787_v38  ;;  %v4876_v37 = vld [vmem:[%s6832_s3 + $0xc0] ss:$8 sps:$4 sm:$0xff]   ;;  %v4881_v38 = vld [vmem:[%s6832_s3 + $0xd4] ss:$8 sps:$4 sm:$0xff]  }
  0xa3   :  { %1386 = vmatpush1.bf16.msra.mxu0 %v4782_v39  ;;  %1558 = vmatpush1.bf16.msra.mxu1 %v4785_v40  ;;  %v4879_v39 = vld [vmem:[%s6832_s3 + $0xd0] ss:$8 sps:$4 sm:$0xff]   ;;  %v4884_v40 = vld [vmem:[%s6832_s3 + $0xe4] ss:$8 sps:$4 sm:$0xff]  }
  0xa4   :  { %1387 = vmatprep.subr.bf16.mxu0 %v4790_v41  ;;  %1559 = vmatprep.subr.bf16.mxu1 %v4793_v42  ;;  %v4882_v41 = vld [vmem:[%s6832_s3 + $0xe0] ss:$8 sps:$4 sm:$0xff]   ;;  %v4887_v42 = vld [vmem:[%s6832_s3 + $0xf4] ss:$8 sps:$4 sm:$0xff]  }
  0xa7   :  { %1388 = vmatpush1.bf16.msra.mxu0 %v4788_v43  ;;  %1560 = vmatpush1.bf16.msra.mxu1 %v4791_v44  ;;  %v4885_v43 = vld [vmem:[%s6832_s3 + $0xf0] ss:$8 sps:$4 sm:$0xff]   ;;  %v4890_v44 = vld [vmem:[%s6832_s3 + $0x104] ss:$8 sps:$4 sm:$0xff]  }
  0xa8   :  { %1389 = vmatprep.subr.bf16.mxu0 %v4796_v45  ;;  %1561 = vmatprep.subr.bf16.mxu1 %v4799_v46  ;;  %v4915_v45 = vld [vmem:[%s6833_s5] ss:$16 sps:$4 sm:$0xff]   ;;  %v4917_v46 = vld [vmem:[%s6833_s5 + $0x4] ss:$16 sps:$4 sm:$0xff]  }
  0xab   :  { %1390 = vmatpush1.bf16.msra.mxu0 %v4794_v47  ;;  %1562 = vmatpush1.bf16.msra.mxu1 %v4797_v48  ;;  %v4918_v47 = vld [vmem:[%s6833_s5 + $0x20] ss:$16 sps:$4 sm:$0xff]   ;;  %v4920_v48 = vld [vmem:[%s6833_s5 + $0x24] ss:$16 sps:$4 sm:$0xff]  }
  0xac   :  { %1391 = vmatprep.subr.bf16.mxu0 %v4802_v49  ;;  %1563 = vmatprep.subr.bf16.mxu1 %v4805_v50  ;;  %v244_v49 = vlaneseq }
  0xae   :  { %v6031_v50 = vshrl.u32 %v244_v49, 7  ;;  %v4930_v49 = vld [vmem:[%s6833_s5 + $0xa0] ss:$16 sps:$4 sm:$0xff]  }
  0xaf   :  { %1392 = vmatpush1.bf16.msra.mxu0 %v4800_v51  ;;  %1564 = vmatpush1.bf16.msra.mxu1 %v4803_v52 }
  0xb0   :  { %1393 = vmatprep.subr.bf16.mxu0 %v4808_v53  ;;  %1565 = vmatprep.subr.bf16.mxu1 %v4811_v54  ;;  %v6034_v51 = vsub.s32 0, %v6031_v50  ;;  %v6037_v52 = vsub.s32 2, %v6031_v50  ;;  %v242_v53 = vld [vmem:[%s6834_s2] sm:$0xf]  ;;  %v6043_v54 = vsub.s32 1, %v6031_v50 }
  0xb3   :  { %1394 = vmatpush1.bf16.msra.mxu0 %v4806_v55  ;;  %1566 = vmatpush1.bf16.msra.mxu1 %v4809_v56  ;;  %v6046_v55 = vsub.s32 3, %v6031_v50  ;;  %v247_v56 = vrot.slane %v242_v53, %v6034_v51 }
  0xb4   :  { %1395 = vmatprep.subr.bf16.mxu0 %v4814_v57  ;;  %1567 = vmatprep.subr.bf16.mxu1 %v4817_v58  ;;  %v255_v57 = vrot.slane %v242_v53, %v6037_v52  ;;  %v251_v58 = vrot.slane %v242_v53, %v6043_v54 }
  0xb7   :  { %1396 = vmatpush1.bf16.msra.mxu0 %v4812_v59  ;;  %1568 = vmatpush1.bf16.msra.mxu1 %v4815_v60  ;;  %v259_v59 = vrot.slane %v242_v53, %v6046_v55  ;;  %v4935_v53 = vld [vmem:[%s6833_s5 + $0xc4] ss:$16 sps:$4 sm:$0xff]  }
  0xb8   :  { %1397 = vmatprep.subr.bf16.mxu0 %v4820_v61  ;;  %1569 = vmatprep.subr.bf16.mxu1 %v4823_v62 }
  0xbb   :  { %1398 = vmatpush1.bf16.msra.mxu0 %v4818_v63  ;;  %1570 = vmatpush1.bf16.msra.mxu1 %v4821_v0 }
  0xbc   :  { %1399 = vmatprep.subr.bf16.mxu0 %v4826_v1  ;;  %1571 = vmatprep.subr.bf16.mxu1 %v4829_v2 }
  0xbf   :  { %1400 = vmatpush1.bf16.msra.mxu0 %v4824_v3  ;;  %1572 = vmatpush1.bf16.msra.mxu1 %v4827_v4 }
  0xc0   :  { %1412 = vmatprep.subr.bf16.mxu0 %v4835_v5  ;;  %1584 = vmatprep.subr.bf16.mxu1 %v4838_v6 }
  0xc2   :  { %1402 = vmatmul.mubr.bf16.vlgmr.msra.gmra.mrb[0].mxu0 %v4830_v7  ;;  %1574 = vmatmul.mubr.bf16.vlgmr.msra.gmra.mrb[0].mxu1 %v4830_v7 }
  0xc3   :  { %1413 = vmatpush1.bf16.msra.mxu0 %v4833_v8  ;;  %1585 = vmatpush1.bf16.msra.mxu1 %v4836_v9 }
  0xc4   :  { %1444 = vmatprep.mubr.bf16.mxu0 %v5245_v11  ;;  %1616 = vmatprep.mubr.bf16.mxu1 %v5245_v11 }
  0xc5   :  { %1954 = vmatprep.subr.bf16.mxu0 %v4842_v10  ;;  %2271 = vmatprep.subr.bf16.mxu1 %v4917_v46  ;;  %v4929_v46 = vld [vmem:[%s6833_s5 + $0x84] ss:$16 sps:$4 sm:$0xff]  }
  0xce   :  { %4169 = vmatmul.mubr.msk.bf16.vlgmr.msra.gmra.mrb[0].mxu0 %vm1279_vm0, %v4839_v12  ;;  %4170 = vmatmul.mubr.msk.bf16.vlgmr.msra.gmra.mrb[0].mxu1 %vm1279_vm0, %v4839_v12 }
  0xcf   :  { %1955 = vmatpush1.bf16.msra.mxu0 %v4840_v13  ;;  %2303 = vmatprep.mubr.bf16.mxu1 %v5245_v11 }
  0xd0   :  { %1956 = vmatprep.subr.bf16.mxu0 %v4845_v14  ;;  %2272 = vmatpush1.bf16.msra.mxu1 %v4915_v45  ;;  %v4924_v45 = vld [vmem:[%s6833_s5 + $0x60] ss:$16 sps:$4 sm:$0xff]  }
  0xd1   :  { %2273 = vmatprep.subr.bf16.mxu1 %v4920_v48  ;;  %v4932_v48 = vld [vmem:[%s6833_s5 + $0xa4] ss:$16 sps:$4 sm:$0xff]  }
  0xd3   :  { %1957 = vmatpush1.bf16.msra.mxu0 %v4843_v15 }
  0xd4   :  { %1958 = vmatprep.subr.bf16.mxu0 %v4848_v16  ;;  %2274 = vmatpush1.bf16.msra.mxu1 %v4918_v47  ;;  %v4927_v47 = vld [vmem:[%s6833_s5 + $0x80] ss:$16 sps:$4 sm:$0xff]  }
  0xd7   :  { %1959 = vmatpush1.bf16.msra.mxu0 %v4846_v17 }
  0xd8   :  { %1960 = vmatprep.subr.bf16.mxu0 %v4851_v18 }
  0xdb   :  { %1961 = vmatpush1.bf16.msra.mxu0 %v4849_v19 }
  0xdc   :  { %1962 = vmatprep.subr.bf16.mxu0 %v4854_v20 }
  0xdf   :  { %1963 = vmatpush1.bf16.msra.mxu0 %v4852_v21 }
  0xe0   :  { %1964 = vmatprep.subr.bf16.mxu0 %v4857_v22 }
  0xe3   :  { %1965 = vmatpush1.bf16.msra.mxu0 %v4855_v23 }
  0xe4   :  { %1966 = vmatprep.subr.bf16.mxu0 %v4860_v24 }
  0xe7   :  { %1967 = vmatpush1.bf16.msra.mxu0 %v4858_v25  ;;  %v4888_v25 = vld [vmem:[%s6832_s3 + $0x100] ss:$8 sps:$4 sm:$0xff]  }
  0xe8   :  { %1968 = vmatprep.subr.bf16.mxu0 %v4863_v26  ;;  %v4893_v26 = vld [vmem:[%s6832_s3 + $0x114] ss:$8 sps:$4 sm:$0xff]  }
  0xeb   :  { %1969 = vmatpush1.bf16.msra.mxu0 %v4861_v27  ;;  %v4891_v27 = vld [vmem:[%s6832_s3 + $0x110] ss:$8 sps:$4 sm:$0xff]  }
  0xec   :  { %1970 = vmatprep.subr.bf16.mxu0 %v4866_v28  ;;  %v4896_v28 = vld [vmem:[%s6832_s3 + $0x124] ss:$8 sps:$4 sm:$0xff]  }
  0xef   :  { %1971 = vmatpush1.bf16.msra.mxu0 %v4864_v29  ;;  %v4894_v29 = vld [vmem:[%s6832_s3 + $0x120] ss:$8 sps:$4 sm:$0xff]  }
  0xf0   :  { %1972 = vmatprep.subr.bf16.mxu0 %v4869_v30  ;;  %v4899_v30 = vld [vmem:[%s6832_s3 + $0x134] ss:$8 sps:$4 sm:$0xff]  }
  0xf3   :  { %1973 = vmatpush1.bf16.msra.mxu0 %v4867_v31  ;;  %v4897_v31 = vld [vmem:[%s6832_s3 + $0x130] ss:$8 sps:$4 sm:$0xff]  }
  0xf4   :  { %1974 = vmatprep.subr.bf16.mxu0 %v4872_v32  ;;  %v4902_v32 = vld [vmem:[%s6832_s3 + $0x144] ss:$8 sps:$4 sm:$0xff]  }
  0xf7   :  { %1975 = vmatpush1.bf16.msra.mxu0 %v4870_v33  ;;  %v4900_v33 = vld [vmem:[%s6832_s3 + $0x140] ss:$8 sps:$4 sm:$0xff]  }
  0xf8   :  { %1976 = vmatprep.subr.bf16.mxu0 %v4875_v34  ;;  %v4905_v34 = vld [vmem:[%s6832_s3 + $0x154] ss:$8 sps:$4 sm:$0xff]  }
  0xfb   :  { %1977 = vmatpush1.bf16.msra.mxu0 %v4873_v35  ;;  %v4903_v35 = vld [vmem:[%s6832_s3 + $0x150] ss:$8 sps:$4 sm:$0xff]  }
  0xfc   :  { %1978 = vmatprep.subr.bf16.mxu0 %v4878_v36  ;;  %v4908_v36 = vld [vmem:[%s6832_s3 + $0x164] ss:$8 sps:$4 sm:$0xff]  }
  0xff   :  { %1979 = vmatpush1.bf16.msra.mxu0 %v4876_v37  ;;  %v4906_v37 = vld [vmem:[%s6832_s3 + $0x160] ss:$8 sps:$4 sm:$0xff]  }
 0x100   :  { %1980 = vmatprep.subr.bf16.mxu0 %v4881_v38  ;;  %v4911_v38 = vld [vmem:[%s6832_s3 + $0x174] ss:$8 sps:$4 sm:$0xff]  }
 0x103   :  { %1981 = vmatpush1.bf16.msra.mxu0 %v4879_v39  ;;  %v4909_v39 = vld [vmem:[%s6832_s3 + $0x170] ss:$8 sps:$4 sm:$0xff]  }
 0x104   :  { %1982 = vmatprep.subr.bf16.mxu0 %v4884_v40  ;;  %v4914_v40 = vld [vmem:[%s6832_s3 + $0x184] ss:$8 sps:$4 sm:$0xff]  }
 0x107   :  { %1983 = vmatpush1.bf16.msra.mxu0 %v4882_v41  ;;  %v4912_v41 = vld [vmem:[%s6832_s3 + $0x180] ss:$8 sps:$4 sm:$0xff]  }
 0x108   :  { %1984 = vmatprep.subr.bf16.mxu0 %v4887_v42  ;;  %v4923_v42 = vld [vmem:[%s6833_s5 + $0x44] ss:$16 sps:$4 sm:$0xff]  }
 0x109   :  { %2275 = vmatprep.subr.bf16.mxu1 %v4923_v42  ;;  %v2045_v42 = vld [vmem:[%s6838_s9 + $0x8] sm:$0xff] }
 0x10b   :  { %1985 = vmatpush1.bf16.msra.mxu0 %v4885_v43  ;;  %v4921_v43 = vld [vmem:[%s6833_s5 + $0x40] ss:$16 sps:$4 sm:$0xff]  }
 0x10c   :  { %1997 = vmatprep.subr.bf16.mxu0 %v4890_v44  ;;  %2276 = vmatpush1.bf16.msra.mxu1 %v4921_v43  ;;  %v4926_v44 = vld [vmem:[%s6833_s5 + $0x64] ss:$16 sps:$4 sm:$0xff]  }
 0x10d   :  { %2277 = vmatprep.subr.bf16.mxu1 %v4926_v44 }
 0x110   :  { %2278 = vmatpush1.bf16.msra.mxu1 %v4924_v45 }
 0x111   :  { %2279 = vmatprep.subr.bf16.mxu1 %v4929_v46 }
 0x114   :  { %2280 = vmatpush1.bf16.msra.mxu1 %v4927_v47 }
 0x115   :  { %2281 = vmatprep.subr.bf16.mxu1 %v4932_v48  ;;  %v4939_v48 = vld [vmem:[%s6833_s5 + $0x8] ss:$16 sps:$4 sm:$0xff]  }
 0x118   :  { %2282 = vmatpush1.bf16.msra.mxu1 %v4930_v49 }
 0x119   :  { %2283 = vmatprep.subr.bf16.mxu1 %v4935_v53  ;;  %v4944_v53 = vld [vmem:[%s6833_s5 + $0x2c] ss:$16 sps:$4 sm:$0xff]  }
 0x1a1   :  { %v1446_v60 = vpop.f32.mrb[0].mxu0  ;;  %v1618_v61 = vpop.f32.mrb[0].mxu1 }
 0x1a2   :  { %v4471_v62 = vadd.f32 %v1446_v60, %v247_v56  ;;  %v4475_v63 = vadd.f32 %v1618_v61, %v255_v57  ;;  %v1448_v0 = vpop.f32.mrb[1].mxu0  ;;  %v1620_v1 = vpop.f32.mrb[1].mxu1  ;;  %v4966_v60 = vld [vmem:[%s6835_s7 + $0x8] ss:$28 sps:$4 sm:$0xff]  }
 0x1a3   :  { %v4472_v2 = vadd.f32 %v1448_v0, %v251_v58  ;;  %v4476_v3 = vadd.f32 %v1620_v1, %v259_v59  ;;  %v1450_v4 = vpop.f32.mrb[2].mxu0  ;;  %v1622_v5 = vpop.f32.mrb[2].mxu1  ;;  %v4968_v61 = vld [vmem:[%s6835_s7 + $0xc] ss:$28 sps:$4 sm:$0xff]   ;;  %v4980_v0 = vld [vmem:[%s6835_s7 + $0x7c] ss:$28 sps:$4 sm:$0xff]  }
 0x1a4   :  { %v4473_v6 = vadd.f32 %v1450_v4, %v247_v56  ;;  %v4477_v7 = vadd.f32 %v1622_v5, %v255_v57  ;;  %v1452_v8 = vpop.f32.mrb[3].mxu0  ;;  %v1624_v9 = vpop.f32.mrb[3].mxu1  ;;  %v1627_v13 = vmax.f32 %v4471_v62, 0.0  ;;  %v1629_v14 = vmax.f32 %v4475_v63, 0.0  ;;  %v4933_v56 = vld [vmem:[%s6833_s5 + $0xc0] ss:$16 sps:$4 sm:$0xff]  }
 0x1a5   :  { %v4474_v10 = vadd.f32 %v1452_v8, %v251_v58  ;;  %v4478_v12 = vadd.f32 %v1624_v9, %v259_v59  ;;  %v1628_v17 = vmax.f32 %v4472_v2, 0.0  ;;  %v1630_v18 = vmax.f32 %v4476_v3, 0.0  ;;  %v4938_v57 = vld [vmem:[%s6833_s5 + $0xe4] ss:$16 sps:$4 sm:$0xff]   ;;  %2284 = vmatpush1.bf16.msra.mxu1 %v4933_v56  ;;  %v4936_v58 = vld [vmem:[%s6833_s5 + $0xe0] ss:$16 sps:$4 sm:$0xff]  }
 0x1a6   :  { %v1631_v15 = vmax.f32 %v4473_v6, 0.0  ;;  %v1633_v16 = vmax.f32 %v4477_v7, 0.0  ;;  %2285 = vmatprep.subr.bf16.mxu1 %v4938_v57  ;;  %v4941_v59 = vld [vmem:[%s6833_s5 + $0xc] ss:$16 sps:$4 sm:$0xff]   ;;  %v4974_v63 = vld [vmem:[%s6835_s7 + $0x44] ss:$28 sps:$4 sm:$0xff]  }
 0x1a7   :  { %v1632_v19 = vmax.f32 %v4474_v10, 0.0  ;;  %v1634_v20 = vmax.f32 %v4478_v12, 0.0  ;;  %v4972_v62 = vld [vmem:[%s6835_s7 + $0x40] ss:$28 sps:$4 sm:$0xff]   ;;  %v4978_v1 = vld [vmem:[%s6835_s7 + $0x78] ss:$28 sps:$4 sm:$0xff]  }
 0x1a8   :  { %v1635_v21 = vpack.c.bf16 %v1631_v15, %v1627_v13  ;;  %v1637_v22 = vpack.c.bf16 %v1633_v16, %v1629_v14  ;;  %v4986_v2 = vld [vmem:[%s6835_s7 + $0xb4] ss:$28 sps:$4 sm:$0xff]   ;;  %v4992_v4 = vld [vmem:[%s6835_s7 + $0xec] ss:$28 sps:$4 sm:$0xff]   ;;  %v4998_v6 = vld [vmem:[%s6835_s7 + $0x124] ss:$28 sps:$4 sm:$0xff]  }
 0x1a9   :  { %v1636_v23 = vpack.c.bf16 %v1632_v19, %v1628_v17  ;;  %v1638_v24 = vpack.c.bf16 %v1634_v20, %v1630_v18  ;;  %2286 = vmatpush1.bf16.msra.mxu1 %v4936_v58  ;;  %v4984_v3 = vld [vmem:[%s6835_s7 + $0xb0] ss:$28 sps:$4 sm:$0xff]   ;;  %v4990_v5 = vld [vmem:[%s6835_s7 + $0xe8] ss:$28 sps:$4 sm:$0xff]   ;;  %v4996_v7 = vld [vmem:[%s6835_s7 + $0x120] ss:$28 sps:$4 sm:$0xff]  }
 0x1aa   :  { %2314 = vmatprep.subr.bf16.mxu1 %v4941_v59  ;;  %v5004_v8 = vld [vmem:[%s6835_s7 + $0x15c] ss:$28 sps:$4 sm:$0xff]   ;;  %v5010_v10 = vld [vmem:[%s6835_s7 + $0x194] ss:$28 sps:$4 sm:$0xff]   ;;  %v5016_v13 = vld [vmem:[%s6835_s7 + $0x1cc] ss:$28 sps:$4 sm:$0xff]  }
 0x1ab   :  { %1986 = vmatprep.mubr.bf16.mxu0 %v1636_v23  ;;  %v5002_v9 = vld [vmem:[%s6835_s7 + $0x158] ss:$28 sps:$4 sm:$0xff]   ;;  %v5008_v12 = vld [vmem:[%s6835_s7 + $0x190] ss:$28 sps:$4 sm:$0xff]   ;;  %v5014_v14 = vld [vmem:[%s6835_s7 + $0x1c8] ss:$28 sps:$4 sm:$0xff]  }
 0x1ac   :  { %1987 = vmatmul.mubr.bf16.vlgmr.msra.gmra.mrb[4].mxu0 %v1635_v21  ;;  %v5022_v15 = vld [vmem:[%s6835_s7 + $0x204] ss:$28 sps:$4 sm:$0xff]   ;;  %v5028_v17 = vld [vmem:[%s6835_s7 + $0x23c] ss:$28 sps:$4 sm:$0xff]   ;;  %v5034_v19 = vld [vmem:[%s6835_s7 + $0x274] ss:$28 sps:$4 sm:$0xff]  }
 0x1ad   :  { %1998 = vmatpush1.bf16.msra.mxu0 %v4888_v25  ;;  %4221 = vmatprep.mubr.msk.bf16.mxu0 %vm1279_vm0, %v1638_v24  ;;  %v5020_v16 = vld [vmem:[%s6835_s7 + $0x200] ss:$28 sps:$4 sm:$0xff]   ;;  %v5026_v18 = vld [vmem:[%s6835_s7 + $0x238] ss:$28 sps:$4 sm:$0xff]   ;;  %v5032_v20 = vld [vmem:[%s6835_s7 + $0x270] ss:$28 sps:$4 sm:$0xff]  }
 0x1ae   :  { %1999 = vmatprep.subr.bf16.mxu0 %v4893_v26  ;;  %v5040_v21 = vld [vmem:[%s6835_s7 + $0x2ac] ss:$28 sps:$4 sm:$0xff]   ;;  %v5046_v23 = vld [vmem:[%s6835_s7 + $0x2e4] ss:$28 sps:$4 sm:$0xff]  }
 0x1af   :  { %v5044_v24 = vld [vmem:[%s6835_s7 + $0x2e0] ss:$28 sps:$4 sm:$0xff]   ;;  %v4942_v56 = vld [vmem:[%s6833_s5 + $0x28] ss:$16 sps:$4 sm:$0xff]  }
 0x1b0   :  { %v1689_v25 = vld [vmem:[%s6836_s4] sm:$0x3]  ;;  %v4947_v57 = vld [vmem:[%s6833_s5 + $0x4c] ss:$16 sps:$4 sm:$0xff]   ;;  %v4945_v58 = vld [vmem:[%s6833_s5 + $0x48] ss:$16 sps:$4 sm:$0xff]  }
 0x1b1   :  { %2000 = vmatpush1.bf16.msra.mxu0 %v4891_v27  ;;  %v1694_v26 = vrot.slane %v1689_v25, %v6034_v51  ;;  %v1698_v27 = vrot.slane %v1689_v25, %v6043_v54  ;;  %v4950_v59 = vld [vmem:[%s6833_s5 + $0x6c] ss:$16 sps:$4 sm:$0xff]   ;;  %v5017_v25 = vld [vmem:[%s6835_s7 + $0x1f8] ss:$28 sps:$4 sm:$0xff]  }
 0x1b2   :  { %2001 = vmatprep.subr.bf16.mxu0 %v4896_v28 }
 0x1b5   :  { %2002 = vmatpush1.bf16.msra.mxu0 %v4894_v29 }
 0x1b6   :  { %2003 = vmatprep.subr.bf16.mxu0 %v4899_v30 }
 0x1b9   :  { %2004 = vmatpush1.bf16.msra.mxu0 %v4897_v31 }
 0x1ba   :  { %2005 = vmatprep.subr.bf16.mxu0 %v4902_v32 }
 0x1bd   :  { %2006 = vmatpush1.bf16.msra.mxu0 %v4900_v33 }
 0x1be   :  { %2007 = vmatprep.subr.bf16.mxu0 %v4905_v34 }
 0x1c1   :  { %2008 = vmatpush1.bf16.msra.mxu0 %v4903_v35 }
 0x1c2   :  { %2009 = vmatprep.subr.bf16.mxu0 %v4908_v36 }
 0x1c5   :  { %2010 = vmatpush1.bf16.msra.mxu0 %v4906_v37 }
 0x1c6   :  { %2011 = vmatprep.subr.bf16.mxu0 %v4911_v38 }
 0x1c9   :  { %2012 = vmatpush1.bf16.msra.mxu0 %v4909_v39 }
 0x1ca   :  { %2013 = vmatprep.subr.bf16.mxu0 %v4914_v40  ;;  %v2044_v40 = vld [vmem:[%s6838_s9] sm:$0xff] }
 0x1cd   :  { %2014 = vmatpush1.bf16.msra.mxu0 %v4912_v41 }
 0x1ce   :  { %3595 = vmatprep.subr.bf16.mxu0 %v4968_v61  ;;  %v4953_v61 = vld [vmem:[%s6833_s5 + $0x8c] ss:$16 sps:$4 sm:$0xff]  }
 0x1d0   :  { %2030 = vmatmul.mubr.bf16.vlgmr.msra.gmra.mrb[4].mxu0 %v1637_v22  ;;  %v5038_v22 = vld [vmem:[%s6835_s7 + $0x2a8] ss:$28 sps:$4 sm:$0xff]  }
 0x1d1   :  { %3596 = vmatpush1.bf16.msra.mxu0 %v4966_v60  ;;  %v4948_v60 = vld [vmem:[%s6833_s5 + $0x68] ss:$16 sps:$4 sm:$0xff]  }
 0x1d2   :  { %3597 = vmatprep.subr.bf16.mxu0 %v4974_v63  ;;  %v4956_v63 = vld [vmem:[%s6833_s5 + $0xac] ss:$16 sps:$4 sm:$0xff]  }
 0x1d5   :  { %3598 = vmatpush1.bf16.msra.mxu0 %v4972_v62  ;;  %v4951_v62 = vld [vmem:[%s6833_s5 + $0x88] ss:$16 sps:$4 sm:$0xff]  }
 0x1d6   :  { %3599 = vmatprep.subr.bf16.mxu0 %v4980_v0  ;;  %v4954_v0 = vld [vmem:[%s6833_s5 + $0xa8] ss:$16 sps:$4 sm:$0xff]  }
 0x1d9   :  { %3600 = vmatpush1.bf16.msra.mxu0 %v4978_v1  ;;  %v4959_v1 = vld [vmem:[%s6833_s5 + $0xcc] ss:$16 sps:$4 sm:$0xff]  }
 0x1da   :  { %3601 = vmatprep.subr.bf16.mxu0 %v4986_v2  ;;  %v4957_v2 = vld [vmem:[%s6833_s5 + $0xc8] ss:$16 sps:$4 sm:$0xff]  }
 0x1dd   :  { %3602 = vmatpush1.bf16.msra.mxu0 %v4984_v3  ;;  %v4962_v3 = vld [vmem:[%s6833_s5 + $0xec] ss:$16 sps:$4 sm:$0xff]  }
 0x1de   :  { %3603 = vmatprep.subr.bf16.mxu0 %v4992_v4  ;;  %v4960_v4 = vld [vmem:[%s6833_s5 + $0xe8] ss:$16 sps:$4 sm:$0xff]  }
 0x1e1   :  { %3604 = vmatpush1.bf16.msra.mxu0 %v4990_v5  ;;  %v4965_v5 = vld [vmem:[%s6835_s7 + $0x4] ss:$28 sps:$4 sm:$0xff]  }
 0x1e2   :  { %3605 = vmatprep.subr.bf16.mxu0 %v4998_v6  ;;  %v4963_v6 = vld [vmem:[%s6835_s7] ss:$28 sps:$4 sm:$0xff]  }
 0x1e5   :  { %3606 = vmatpush1.bf16.msra.mxu0 %v4996_v7  ;;  %v4971_v7 = vld [vmem:[%s6835_s7 + $0x3c] ss:$28 sps:$4 sm:$0xff]  }
 0x1e6   :  { %3607 = vmatprep.subr.bf16.mxu0 %v5004_v8  ;;  %v4969_v8 = vld [vmem:[%s6835_s7 + $0x38] ss:$28 sps:$4 sm:$0xff]  }
 0x1e9   :  { %3608 = vmatpush1.bf16.msra.mxu0 %v5002_v9  ;;  %v4977_v9 = vld [vmem:[%s6835_s7 + $0x74] ss:$28 sps:$4 sm:$0xff]  }
 0x1ea   :  { %3609 = vmatprep.subr.bf16.mxu0 %v5010_v10  ;;  %v4975_v10 = vld [vmem:[%s6835_s7 + $0x70] ss:$28 sps:$4 sm:$0xff]  }
 0x1ed   :  { %3610 = vmatpush1.bf16.msra.mxu0 %v5008_v12  ;;  %v4983_v12 = vld [vmem:[%s6835_s7 + $0xac] ss:$28 sps:$4 sm:$0xff]  }
 0x1ee   :  { %3611 = vmatprep.subr.bf16.mxu0 %v5016_v13  ;;  %v4981_v13 = vld [vmem:[%s6835_s7 + $0xa8] ss:$28 sps:$4 sm:$0xff]  }
 0x1f1   :  { %3612 = vmatpush1.bf16.msra.mxu0 %v5014_v14  ;;  %v4989_v14 = vld [vmem:[%s6835_s7 + $0xe4] ss:$28 sps:$4 sm:$0xff]  }
 0x1f2   :  { %3613 = vmatprep.subr.bf16.mxu0 %v5022_v15  ;;  %v4987_v15 = vld [vmem:[%s6835_s7 + $0xe0] ss:$28 sps:$4 sm:$0xff]  }
 0x1f5   :  { %3614 = vmatpush1.bf16.msra.mxu0 %v5020_v16  ;;  %v4995_v16 = vld [vmem:[%s6835_s7 + $0x11c] ss:$28 sps:$4 sm:$0xff]  }
 0x1f6   :  { %3615 = vmatprep.subr.bf16.mxu0 %v5028_v17  ;;  %v4993_v17 = vld [vmem:[%s6835_s7 + $0x118] ss:$28 sps:$4 sm:$0xff]  }
 0x1f9   :  { %3616 = vmatpush1.bf16.msra.mxu0 %v5026_v18  ;;  %v5001_v18 = vld [vmem:[%s6835_s7 + $0x154] ss:$28 sps:$4 sm:$0xff]  }
 0x1fa   :  { %3617 = vmatprep.subr.bf16.mxu0 %v5034_v19  ;;  %v4999_v19 = vld [vmem:[%s6835_s7 + $0x150] ss:$28 sps:$4 sm:$0xff]  }
 0x1fd   :  { %3618 = vmatpush1.bf16.msra.mxu0 %v5032_v20  ;;  %v5007_v20 = vld [vmem:[%s6835_s7 + $0x18c] ss:$28 sps:$4 sm:$0xff]  }
 0x1fe   :  { %3619 = vmatprep.subr.bf16.mxu0 %v5040_v21  ;;  %v5005_v21 = vld [vmem:[%s6835_s7 + $0x188] ss:$28 sps:$4 sm:$0xff]  }
 0x201   :  { %3620 = vmatpush1.bf16.msra.mxu0 %v5038_v22  ;;  %v5013_v22 = vld [vmem:[%s6835_s7 + $0x1c4] ss:$28 sps:$4 sm:$0xff]  }
 0x202   :  { %3621 = vmatprep.subr.bf16.mxu0 %v5046_v23  ;;  %v5011_v23 = vld [vmem:[%s6835_s7 + $0x1c0] ss:$28 sps:$4 sm:$0xff]  }
 0x205   :  { %3622 = vmatpush1.bf16.msra.mxu0 %v5044_v24  ;;  %v5019_v24 = vld [vmem:[%s6835_s7 + $0x1fc] ss:$28 sps:$4 sm:$0xff]  }
 0x2a3   :  { %v2031_v28 = vpop.f32.mrb[4].mxu0 }
 0x2a4   :  { %v4479_v29 = vadd.f32 %v2031_v28, %v1694_v26  ;;  %v2033_v30 = vpop.f32.mrb[5].mxu0  ;;  %v5031_v28 = vld [vmem:[%s6835_s7 + $0x26c] ss:$28 sps:$4 sm:$0xff]  }
 0x2a5   :  { %v4480_v31 = vadd.f32 %v2033_v30, %v1698_v27  ;;  %v2035_v32 = vpop.f32.mrb[6].mxu0  ;;  %v5037_v30 = vld [vmem:[%s6835_s7 + $0x2a4] ss:$28 sps:$4 sm:$0xff]  }
 0x2a6   :  { %2040 = vst [vmem:[%s6837_s11] sm:$0xff] %v4479_v29  ;;  %v4481_v33 = vadd.f32 %v2035_v32, %v1694_v26  ;;  %v2037_v34 = vpop.f32.mrb[7].mxu0  ;;  %v5025_v26 = vld [vmem:[%s6835_s7 + $0x234] ss:$28 sps:$4 sm:$0xff]   ;;  %v5043_v32 = vld [vmem:[%s6835_s7 + $0x2dc] ss:$28 sps:$4 sm:$0xff]  }
 0x2a7   :  { %2041 = vst [vmem:[%s6837_s11 + $0x8] sm:$0xff] %v4480_v31  ;;  %v2046_v35 = vmul.f32 0.5, %v4480_v31  ;;  %v4482_v36 = vadd.f32 %v2037_v34, %v1698_v27  ;;  %v5023_v27 = vld [vmem:[%s6835_s7 + $0x230] ss:$28 sps:$4 sm:$0xff]   ;;  %v5035_v31 = vld [vmem:[%s6835_s7 + $0x2a0] ss:$28 sps:$4 sm:$0xff]  }
 0x2a8   :  { %2042 = vst [vmem:[%s6837_s11 + $0x10] sm:$0xff] %v4481_v33  ;;  %v5049_v34 = vld [vmem:[%s6835_s7 + $0x314] ss:$28 sps:$4 sm:$0xff]  }
 0x2a9   :  { %v2048_v37 = vmul.f32 1.442695, %v2046_v35  ;;  %2043 = vst [vmem:[%s6837_s11 + $0x18] sm:$0xff] %v4482_v36  ;;  %v2047_v38 = vmul.f32 0.5, %v4482_v36  ;;  %v5052_v35 = vld [vmem:[%s6835_s7 + $0x31c] ss:$28 sps:$4 sm:$0xff]  }
 0x2aa   :  { %v5047_v36 = vld [vmem:[%s6835_s7 + $0x310] ss:$28 sps:$4 sm:$0xff]   ;;  %3623 = vmatprep.subr.bf16.mxu0 %v5052_v35 }
 0x2ab   :  { %5213 = vpow2.f32 %v2048_v37  ;;  %v2050_v39 = vmul.f32 1.442695, %v2047_v38  ;;  %v5050_v37 = vld [vmem:[%s6835_s7 + $0x318] ss:$28 sps:$4 sm:$0xff]   ;;  %v5055_v38 = vld [vmem:[%s6835_s7 + $0x34c] ss:$28 sps:$4 sm:$0xff]  }
 0x2ac   :  { %3624 = vmatpush1.bf16.msra.mxu0 %v5050_v37  ;;  %v5106_v35 = vld [vmem:[%s6835_s7 + $0x514] ss:$28 sps:$4 sm:$0xff]  }
 0x2ad   :  { %5215 = vpow2.f32 %v2050_v39  ;;  %v5058_v39 = vld [vmem:[%s6835_s7 + $0x354] ss:$28 sps:$4 sm:$0xff]  }
 0x2ae   :  { %3625 = vmatprep.subr.bf16.mxu0 %v5058_v39 }
 0x2b5   :  { %v5214_v41 = vpop.eup %5213 }
 0x2b6   :  { %v2052_v43 = vmul.f32 %v5214_v41, %v2044_v40  ;;  %v5053_v40 = vld [vmem:[%s6835_s7 + $0x348] ss:$28 sps:$4 sm:$0xff]   ;;  %v5056_v41 = vld [vmem:[%s6835_s7 + $0x350] ss:$28 sps:$4 sm:$0xff]  }
 0x2b7   :  { %v5216_v44 = vpop.eup %5215  ;;  %3626 = vmatpush1.bf16.msra.mxu0 %v5056_v41  ;;  %v5101_v41 = vld [vmem:[%s6835_s7 + $0x508] ss:$28 sps:$4 sm:$0xff]  }
 0x2b8   :  { %v2053_v45 = vmul.f32 %v5216_v44, %v2045_v42  ;;  %v2054_v46 = vadd.f32 %v4479_v29, %v2052_v43  ;;  %v5029_v29 = vld [vmem:[%s6835_s7 + $0x268] ss:$28 sps:$4 sm:$0xff]   ;;  %v6413_v44 = vld [vmem:[%s6839_s6] sm:$0xf] }
 0x2b9   :  { %v5061_v42 = vld [vmem:[%s6835_s7 + $0x384] ss:$28 sps:$4 sm:$0xff]   ;;  %v5064_v43 = vld [vmem:[%s6835_s7 + $0x38c] ss:$28 sps:$4 sm:$0xff]  }
 0x2ba   :  { %v2055_v47 = vadd.f32 %v4481_v33, %v2053_v45  ;;  %v5041_v33 = vld [vmem:[%s6835_s7 + $0x2d8] ss:$28 sps:$4 sm:$0xff]   ;;  %3638 = vmatprep.subr.bf16.mxu0 %v5064_v43  ;;  %v2094_v45 = vrot.slane %v6413_v44, %v6034_v51 }
 0x2bc   :  { %v2056_v49 = vpack.c.bf16 %v2055_v47, %v2054_v46  ;;  %v2098_v46 = vrot.slane %v6413_v44, %v6043_v54 }
 0x2be   :  { %2304 = vmatmul.mubr.bf16.vlgmr.msra.gmra.mrb[4].mxu1 %v2056_v49 }
 0x2bf   :  { %2315 = vmatpush1.bf16.msra.mxu1 %v4939_v48  ;;  %2346 = vmatprep.mubr.bf16.mxu1 %v5245_v11 }
 0x2c0   :  { %2316 = vmatprep.subr.bf16.mxu1 %v4944_v53 }
 0x2c3   :  { %2317 = vmatpush1.bf16.msra.mxu1 %v4942_v56 }
 0x2c4   :  { %2318 = vmatprep.subr.bf16.mxu1 %v4947_v57 }
 0x2c7   :  { %2319 = vmatpush1.bf16.msra.mxu1 %v4945_v58 }
 0x2c8   :  { %2320 = vmatprep.subr.bf16.mxu1 %v4950_v59 }
 0x2cb   :  { %2321 = vmatpush1.bf16.msra.mxu1 %v4948_v60 }
 0x2cc   :  { %2322 = vmatprep.subr.bf16.mxu1 %v4953_v61 }
 0x2cf   :  { %2323 = vmatpush1.bf16.msra.mxu1 %v4951_v62 }
 0x2d0   :  { %2324 = vmatprep.subr.bf16.mxu1 %v4956_v63 }
 0x2d3   :  { %2325 = vmatpush1.bf16.msra.mxu1 %v4954_v0 }
 0x2d4   :  { %2326 = vmatprep.subr.bf16.mxu1 %v4959_v1 }
 0x2d7   :  { %2327 = vmatpush1.bf16.msra.mxu1 %v4957_v2  ;;  %v5059_v2 = vld [vmem:[%s6835_s7 + $0x380] ss:$28 sps:$4 sm:$0xff]  }
 0x2d8   :  { %2328 = vmatprep.subr.bf16.mxu1 %v4962_v3  ;;  %v5062_v3 = vld [vmem:[%s6835_s7 + $0x388] ss:$28 sps:$4 sm:$0xff]  }
 0x2db   :  { %2329 = vmatpush1.bf16.msra.mxu1 %v4960_v4  ;;  %v5067_v4 = vld [vmem:[%s6835_s7 + $0x3bc] ss:$28 sps:$4 sm:$0xff]  }
 0x2dc   :  { %3509 = vmatprep.subr.bf16.mxu1 %v4965_v5  ;;  %v5070_v5 = vld [vmem:[%s6835_s7 + $0x3c4] ss:$28 sps:$4 sm:$0xff]  }
 0x2de   :  { %2347 = vmatmul.mubr.bf16.vlgmr.msra.gmra.mrb[8].mxu1 %v2056_v49 }
 0x2df   :  { %3510 = vmatpush1.bf16.msra.mxu1 %v4963_v6  ;;  %v5065_v6 = vld [vmem:[%s6835_s7 + $0x3b8] ss:$28 sps:$4 sm:$0xff]  }
 0x2e0   :  { %3511 = vmatprep.subr.bf16.mxu1 %v4971_v7  ;;  %v5068_v7 = vld [vmem:[%s6835_s7 + $0x3c0] ss:$28 sps:$4 sm:$0xff]  }
 0x2e3   :  { %3512 = vmatpush1.bf16.msra.mxu1 %v4969_v8  ;;  %v5073_v8 = vld [vmem:[%s6835_s7 + $0x3f4] ss:$28 sps:$4 sm:$0xff]  }
 0x2e4   :  { %3513 = vmatprep.subr.bf16.mxu1 %v4977_v9  ;;  %v5076_v9 = vld [vmem:[%s6835_s7 + $0x3fc] ss:$28 sps:$4 sm:$0xff]  }
 0x2e7   :  { %3514 = vmatpush1.bf16.msra.mxu1 %v4975_v10  ;;  %v5071_v10 = vld [vmem:[%s6835_s7 + $0x3f0] ss:$28 sps:$4 sm:$0xff]  }
 0x2e8   :  { %3515 = vmatprep.subr.bf16.mxu1 %v4983_v12  ;;  %v5074_v12 = vld [vmem:[%s6835_s7 + $0x3f8] ss:$28 sps:$4 sm:$0xff]  }
 0x2eb   :  { %3516 = vmatpush1.bf16.msra.mxu1 %v4981_v13  ;;  %v5079_v13 = vld [vmem:[%s6835_s7 + $0x42c] ss:$28 sps:$4 sm:$0xff]  }
 0x2ec   :  { %3517 = vmatprep.subr.bf16.mxu1 %v4989_v14  ;;  %v5082_v14 = vld [vmem:[%s6835_s7 + $0x434] ss:$28 sps:$4 sm:$0xff]  }
 0x2ef   :  { %3518 = vmatpush1.bf16.msra.mxu1 %v4987_v15  ;;  %v5077_v15 = vld [vmem:[%s6835_s7 + $0x428] ss:$28 sps:$4 sm:$0xff]  }
 0x2f0   :  { %3519 = vmatprep.subr.bf16.mxu1 %v4995_v16  ;;  %v5080_v16 = vld [vmem:[%s6835_s7 + $0x430] ss:$28 sps:$4 sm:$0xff]  }
 0x2f3   :  { %3520 = vmatpush1.bf16.msra.mxu1 %v4993_v17  ;;  %v5085_v17 = vld [vmem:[%s6835_s7 + $0x464] ss:$28 sps:$4 sm:$0xff]  }
 0x2f4   :  { %3521 = vmatprep.subr.bf16.mxu1 %v5001_v18  ;;  %v5088_v18 = vld [vmem:[%s6835_s7 + $0x46c] ss:$28 sps:$4 sm:$0xff]  }
 0x2f7   :  { %3522 = vmatpush1.bf16.msra.mxu1 %v4999_v19  ;;  %v5083_v19 = vld [vmem:[%s6835_s7 + $0x460] ss:$28 sps:$4 sm:$0xff]  }
 0x2f8   :  { %3523 = vmatprep.subr.bf16.mxu1 %v5007_v20  ;;  %v5086_v20 = vld [vmem:[%s6835_s7 + $0x468] ss:$28 sps:$4 sm:$0xff]  }
 0x2fb   :  { %3524 = vmatpush1.bf16.msra.mxu1 %v5005_v21  ;;  %v5091_v21 = vld [vmem:[%s6835_s7 + $0x49c] ss:$28 sps:$4 sm:$0xff]  }
 0x2fc   :  { %3525 = vmatprep.subr.bf16.mxu1 %v5013_v22  ;;  %v5094_v22 = vld [vmem:[%s6835_s7 + $0x4a4] ss:$28 sps:$4 sm:$0xff]  }
 0x2ff   :  { %3526 = vmatpush1.bf16.msra.mxu1 %v5011_v23  ;;  %v5089_v23 = vld [vmem:[%s6835_s7 + $0x498] ss:$28 sps:$4 sm:$0xff]  }
 0x300   :  { %3527 = vmatprep.subr.bf16.mxu1 %v5019_v24  ;;  %v5092_v24 = vld [vmem:[%s6835_s7 + $0x4a0] ss:$28 sps:$4 sm:$0xff]  }
 0x303   :  { %3528 = vmatpush1.bf16.msra.mxu1 %v5017_v25  ;;  %v2102_v25 = vrot.slane %v6413_v44, %v6037_v52 }
 0x304   :  { %3529 = vmatprep.subr.bf16.mxu1 %v5025_v26  ;;  %v5097_v26 = vld [vmem:[%s6835_s7 + $0x4d4] ss:$28 sps:$4 sm:$0xff]  }
 0x307   :  { %3530 = vmatpush1.bf16.msra.mxu1 %v5023_v27  ;;  %v5100_v27 = vld [vmem:[%s6835_s7 + $0x4dc] ss:$28 sps:$4 sm:$0xff]  }
 0x308   :  { %3531 = vmatprep.subr.bf16.mxu1 %v5031_v28  ;;  %v2106_v28 = vrot.slane %v6413_v44, %v6046_v55 }
 0x30b   :  { %3532 = vmatpush1.bf16.msra.mxu1 %v5029_v29 }
 0x30c   :  { %3533 = vmatprep.subr.bf16.mxu1 %v5037_v30  ;;  %v5095_v30 = vld [vmem:[%s6835_s7 + $0x4d0] ss:$28 sps:$4 sm:$0xff]  }
 0x30f   :  { %3534 = vmatpush1.bf16.msra.mxu1 %v5035_v31  ;;  %v5098_v31 = vld [vmem:[%s6835_s7 + $0x4d8] ss:$28 sps:$4 sm:$0xff]  }
 0x310   :  { %3535 = vmatprep.subr.bf16.mxu1 %v5043_v32 }
 0x313   :  { %3536 = vmatpush1.bf16.msra.mxu1 %v5041_v33 }
 0x314   :  { %3537 = vmatprep.subr.bf16.mxu1 %v5049_v34  ;;  %v5103_v34 = vld [vmem:[%s6835_s7 + $0x50c] ss:$28 sps:$4 sm:$0xff]  }
 0x317   :  { %3538 = vmatpush1.bf16.msra.mxu1 %v5047_v36 }
 0x318   :  { %3539 = vmatprep.subr.bf16.mxu1 %v5055_v38 }
 0x31b   :  { %3540 = vmatpush1.bf16.msra.mxu1 %v5053_v40 }
 0x31c   :  { %3552 = vmatprep.subr.bf16.mxu1 %v5061_v42  ;;  %v5104_v42 = vld [vmem:[%s6835_s7 + $0x510] ss:$28 sps:$4 sm:$0xff]  }
 0x391   :  { %v2305_v47 = vpop.f32.mrb[4].mxu1 }
 0x392   :  { %v2306_v48 = vadd.f32 %v2305_v47, %v2094_v45  ;;  %v2307_v49 = vpop.f32.mrb[5].mxu1 }
 0x393   :  { %v2308_v53 = vadd.f32 %v2307_v49, %v2098_v46  ;;  %v2309_v56 = vpop.f32.mrb[6].mxu1 }
 0x394   :  { %v2310_v57 = vadd.f32 %v2309_v56, %v2094_v45  ;;  %v2311_v58 = vpop.f32.mrb[7].mxu1  ;;  %v2357_v60 = vmax.f32 %v2306_v48, 0.0  ;;  %v5109_v45 = vld [vmem:[%s6835_s7 + $0x544] ss:$28 sps:$4 sm:$0xff]  }
 0x395   :  { %v2312_v59 = vadd.f32 %v2311_v58, %v2098_v46  ;;  %v2358_v62 = vmax.f32 %v2308_v53, 0.0  ;;  %v5112_v46 = vld [vmem:[%s6835_s7 + $0x54c] ss:$28 sps:$4 sm:$0xff]   ;;  %v5107_v56 = vld [vmem:[%s6835_s7 + $0x540] ss:$28 sps:$4 sm:$0xff]  }
 0x396   :  { %v2361_v61 = vmax.f32 %v2310_v57, 0.0  ;;  %v5110_v57 = vld [vmem:[%s6835_s7 + $0x548] ss:$28 sps:$4 sm:$0xff]   ;;  %v5115_v58 = vld [vmem:[%s6835_s7 + $0x14] ss:$28 sps:$4 sm:$0xff]  }
 0x397   :  { %v2362_v63 = vmax.f32 %v2312_v59, 0.0  ;;  %v5116_v59 = vld [vmem:[%s6835_s7 + $0x1d8] ss:$28 sps:$4 sm:$0xff]  }
 0x398   :  { %v6419_v0 = vpack.c.bf16 %v2361_v61, %v2357_v60  ;;  %v5113_v60 = vld [vmem:[%s6835_s7 + $0x10] ss:$28 sps:$4 sm:$0xff]   ;;  %v5117_v61 = vld [vmem:[%s6835_s7 + $0x18] ss:$28 sps:$4 sm:$0xff]  }
 0x399   :  { %v6421_v1 = vpack.c.bf16 %v2362_v63, %v2358_v62  ;;  %v5120_v62 = vld [vmem:[%s6835_s7 + $0x4c] ss:$28 sps:$4 sm:$0xff]  }
 0x39a   :  { %v5121_v63 = vld [vmem:[%s6835_s7 + $0x210] ss:$28 sps:$4 sm:$0xff]  }
 0x39b   :  { %3541 = vmatprep.mubr.bf16.mxu1 %v6421_v1  ;;  %3627 = vmatprep.mubr.bf16.mxu0 %v6421_v1 }
 0x39c   :  { %3542 = vmatmul.mubr.bf16.vlgmr.msra.gmra.mrb[12].mxu1 %v6419_v0  ;;  %3628 = vmatmul.mubr.bf16.vlgmr.msra.gmra.mrb[8].mxu0 %v6419_v0 }
 0x39d   :  { %3553 = vmatpush1.bf16.msra.mxu1 %v5059_v2  ;;  %3639 = vmatpush1.bf16.msra.mxu0 %v5062_v3  ;;  %v5118_v2 = vld [vmem:[%s6835_s7 + $0x48] ss:$28 sps:$4 sm:$0xff]   ;;  %v5122_v3 = vld [vmem:[%s6835_s7 + $0x50] ss:$28 sps:$4 sm:$0xff]  }
 0x39e   :  { %3554 = vmatprep.subr.bf16.mxu1 %v5067_v4  ;;  %3640 = vmatprep.subr.bf16.mxu0 %v5070_v5  ;;  %v5125_v4 = vld [vmem:[%s6835_s7 + $0x84] ss:$28 sps:$4 sm:$0xff]  }
 0x39f   :  { %v5126_v5 = vld [vmem:[%s6835_s7 + $0x248] ss:$28 sps:$4 sm:$0xff]  }
 0x3a1   :  { %3555 = vmatpush1.bf16.msra.mxu1 %v5065_v6  ;;  %3641 = vmatpush1.bf16.msra.mxu0 %v5068_v7  ;;  %v5123_v6 = vld [vmem:[%s6835_s7 + $0x80] ss:$28 sps:$4 sm:$0xff]  }
 0x3a2   :  { %3556 = vmatprep.subr.bf16.mxu1 %v5073_v8  ;;  %3642 = vmatprep.subr.bf16.mxu0 %v5076_v9  ;;  %v5130_v7 = vld [vmem:[%s6835_s7 + $0xbc] ss:$28 sps:$4 sm:$0xff]  }
 0x3a3   :  { %v5131_v8 = vld [vmem:[%s6835_s7 + $0x280] ss:$28 sps:$4 sm:$0xff]   ;;  %v5128_v9 = vld [vmem:[%s6835_s7 + $0xb8] ss:$28 sps:$4 sm:$0xff]  }
 0x3a5   :  { %3557 = vmatpush1.bf16.msra.mxu1 %v5071_v10  ;;  %3643 = vmatpush1.bf16.msra.mxu0 %v5074_v12  ;;  %v5132_v10 = vld [vmem:[%s6835_s7 + $0xc0] ss:$28 sps:$4 sm:$0xff]   ;;  %v5135_v12 = vld [vmem:[%s6835_s7 + $0xf4] ss:$28 sps:$4 sm:$0xff]  }
 0x3a6   :  { %3558 = vmatprep.subr.bf16.mxu1 %v5079_v13  ;;  %3644 = vmatprep.subr.bf16.mxu0 %v5082_v14  ;;  %v5136_v13 = vld [vmem:[%s6835_s7 + $0x2b8] ss:$28 sps:$4 sm:$0xff]   ;;  %v5133_v14 = vld [vmem:[%s6835_s7 + $0xf0] ss:$28 sps:$4 sm:$0xff]  }
 0x3a9   :  { %3559 = vmatpush1.bf16.msra.mxu1 %v5077_v15  ;;  %3645 = vmatpush1.bf16.msra.mxu0 %v5080_v16  ;;  %v5137_v15 = vld [vmem:[%s6835_s7 + $0xf8] ss:$28 sps:$4 sm:$0xff]   ;;  %v5140_v16 = vld [vmem:[%s6835_s7 + $0x12c] ss:$28 sps:$4 sm:$0xff]  }
 0x3aa   :  { %3560 = vmatprep.subr.bf16.mxu1 %v5085_v17  ;;  %3646 = vmatprep.subr.bf16.mxu0 %v5088_v18  ;;  %v5141_v17 = vld [vmem:[%s6835_s7 + $0x2f0] ss:$28 sps:$4 sm:$0xff]   ;;  %v5138_v18 = vld [vmem:[%s6835_s7 + $0x128] ss:$28 sps:$4 sm:$0xff]  }
 0x3ad   :  { %3561 = vmatpush1.bf16.msra.mxu1 %v5083_v19  ;;  %3647 = vmatpush1.bf16.msra.mxu0 %v5086_v20  ;;  %v5142_v19 = vld [vmem:[%s6835_s7 + $0x130] ss:$28 sps:$4 sm:$0xff]   ;;  %v5145_v20 = vld [vmem:[%s6835_s7 + $0x164] ss:$28 sps:$4 sm:$0xff]  }
 0x3ae   :  { %3562 = vmatprep.subr.bf16.mxu1 %v5091_v21  ;;  %3648 = vmatprep.subr.bf16.mxu0 %v5094_v22  ;;  %v5146_v21 = vld [vmem:[%s6835_s7 + $0x328] ss:$28 sps:$4 sm:$0xff]   ;;  %v5143_v22 = vld [vmem:[%s6835_s7 + $0x160] ss:$28 sps:$4 sm:$0xff]  }
 0x3b1   :  { %v2348_v29 = vpop.f32.mrb[8].mxu1  ;;  %3563 = vmatpush1.bf16.msra.mxu1 %v5089_v23  ;;  %3649 = vmatpush1.bf16.msra.mxu0 %v5092_v24  ;;  %v5147_v23 = vld [vmem:[%s6835_s7 + $0x168] ss:$28 sps:$4 sm:$0xff]   ;;  %v5150_v24 = vld [vmem:[%s6835_s7 + $0x19c] ss:$28 sps:$4 sm:$0xff]  }
 0x3b2   :  { %v2349_v32 = vadd.f32 %v2348_v29, %v2102_v25  ;;  %v2350_v33 = vpop.f32.mrb[9].mxu1  ;;  %3564 = vmatprep.subr.bf16.mxu1 %v5097_v26  ;;  %3650 = vmatprep.subr.bf16.mxu0 %v5100_v27  ;;  %v5148_v26 = vld [vmem:[%s6835_s7 + $0x198] ss:$28 sps:$4 sm:$0xff]   ;;  %v5152_v27 = vld [vmem:[%s6835_s7 + $0x1a0] ss:$28 sps:$4 sm:$0xff]  }
 0x3b3   :  { %v2351_v36 = vadd.f32 %v2350_v33, %v2106_v28  ;;  %v2352_v37 = vpop.f32.mrb[10].mxu1  ;;  %v5153_v29 = vld [vmem:[%s6835_s7 + $0x1d0] ss:$28 sps:$4 sm:$0xff]  }
 0x3b4   :  { %v2353_v38 = vadd.f32 %v2352_v37, %v2102_v25  ;;  %v2354_v39 = vpop.f32.mrb[11].mxu1  ;;  %v2359_v43 = vmax.f32 %v2349_v32, 0.0  ;;  %v5151_v25 = vld [vmem:[%s6835_s7 + $0x360] ss:$28 sps:$4 sm:$0xff]   ;;  %v5157_v32 = vld [vmem:[%s6835_s7 + $0x208] ss:$28 sps:$4 sm:$0xff]  }
 0x3b5   :  { %v2355_v40 = vadd.f32 %v2354_v39, %v2106_v28  ;;  %3565 = vmatpush1.bf16.msra.mxu1 %v5095_v30  ;;  %3651 = vmatpush1.bf16.msra.mxu0 %v5098_v31  ;;  %v2360_v47 = vmax.f32 %v2351_v36, 0.0  ;;  %v5155_v28 = vld [vmem:[%s6835_s7 + $0x1d4] ss:$28 sps:$4 sm:$0xff]   ;;  %v5159_v31 = vld [vmem:[%s6835_s7 + $0x20c] ss:$28 sps:$4 sm:$0xff]  }
 0x3b6   :  { %v2363_v44 = vmax.f32 %v2353_v38, 0.0  ;;  %3566 = vmatprep.subr.bf16.mxu1 %v5103_v34  ;;  %3652 = vmatprep.subr.bf16.mxu0 %v5106_v35  ;;  %v5156_v30 = vld [vmem:[%s6835_s7 + $0x398] ss:$28 sps:$4 sm:$0xff]   ;;  %v5160_v33 = vld [vmem:[%s6835_s7 + $0x3d0] ss:$28 sps:$4 sm:$0xff]  }
 0x3b7   :  { %v2364_v48 = vmax.f32 %v2355_v40, 0.0  ;;  %v5163_v34 = vld [vmem:[%s6835_s7 + $0x244] ss:$28 sps:$4 sm:$0xff]   ;;  %v5167_v37 = vld [vmem:[%s6835_s7 + $0x27c] ss:$28 sps:$4 sm:$0xff]  }
 0x3b8   :  { %v6527_v49 = vpack.c.bf16 %v2363_v44, %v2359_v43  ;;  %v5161_v35 = vld [vmem:[%s6835_s7 + $0x240] ss:$28 sps:$4 sm:$0xff]   ;;  %v5164_v36 = vld [vmem:[%s6835_s7 + $0x408] ss:$28 sps:$4 sm:$0xff]   ;;  %v5165_v38 = vld [vmem:[%s6835_s7 + $0x278] ss:$28 sps:$4 sm:$0xff]  }
 0x3b9   :  { %v6529_v53 = vpack.c.bf16 %v2364_v48, %v2360_v47  ;;  %3567 = vmatpush1.bf16.msra.mxu1 %v5101_v41  ;;  %3653 = vmatpush1.bf16.msra.mxu0 %v5104_v42  ;;  %v5168_v39 = vld [vmem:[%s6835_s7 + $0x440] ss:$28 sps:$4 sm:$0xff]   ;;  %v5171_v40 = vld [vmem:[%s6835_s7 + $0x2b4] ss:$28 sps:$4 sm:$0xff]   ;;  %v5175_v43 = vld [vmem:[%s6835_s7 + $0x2ec] ss:$28 sps:$4 sm:$0xff]  }
 0x3ba   :  { %3568 = vmatprep.subr.bf16.mxu1 %v5109_v45  ;;  %3654 = vmatprep.subr.bf16.mxu0 %v5112_v46  ;;  %v5169_v41 = vld [vmem:[%s6835_s7 + $0x2b0] ss:$28 sps:$4 sm:$0xff]   ;;  %v5172_v42 = vld [vmem:[%s6835_s7 + $0x478] ss:$28 sps:$4 sm:$0xff]   ;;  %v5173_v44 = vld [vmem:[%s6835_s7 + $0x2e8] ss:$28 sps:$4 sm:$0xff]  }
 0x3bb   :  { %4429 = vmatprep.mubr.msk.bf16.mxu1 %vm1279_vm0, %v6529_v53  ;;  %4430 = vmatprep.mubr.msk.bf16.mxu0 %vm1279_vm0, %v6529_v53  ;;  %v5176_v45 = vld [vmem:[%s6835_s7 + $0x4b0] ss:$28 sps:$4 sm:$0xff]   ;;  %v5179_v46 = vld [vmem:[%s6835_s7 + $0x324] ss:$28 sps:$4 sm:$0xff]  }
 0x3bc   :  { %v5177_v47 = vld [vmem:[%s6835_s7 + $0x320] ss:$28 sps:$4 sm:$0xff]   ;;  %v5180_v48 = vld [vmem:[%s6835_s7 + $0x4e8] ss:$28 sps:$4 sm:$0xff]  }
 0x3bd   :  { %3569 = vmatpush1.bf16.msra.mxu1 %v5107_v56  ;;  %3655 = vmatpush1.bf16.msra.mxu0 %v5110_v57  ;;  %v5183_v56 = vld [vmem:[%s6835_s7 + $0x35c] ss:$28 sps:$4 sm:$0xff]  }
 0x3be   :  { %3681 = vmatprep.subr.bf16.mxu1 %v5115_v58  ;;  %4449 = vmatprep.subr.bf16.mxu0 %v5116_v59  ;;  %v5181_v57 = vld [vmem:[%s6835_s7 + $0x358] ss:$28 sps:$4 sm:$0xff]   ;;  %v5184_v58 = vld [vmem:[%s6835_s7 + $0x520] ss:$28 sps:$4 sm:$0xff]  }
 0x3bf   :  { %v5187_v59 = vld [vmem:[%s6835_s7 + $0x394] ss:$28 sps:$4 sm:$0xff]  }
 0x3c0   :  { %3585 = vmatmul.mubr.bf16.vlgmr.msra.gmra.mrb[12].mxu1 %v6527_v49  ;;  %3671 = vmatmul.mubr.bf16.vlgmr.msra.gmra.mrb[8].mxu0 %v6527_v49 }
 0x3c1   :  { %3682 = vmatpush1.bf16.msra.mxu1 %v5113_v60  ;;  %3713 = vmatprep.mubr.bf16.mxu1 %v6421_v1  ;;  %v5185_v60 = vld [vmem:[%s6835_s7 + $0x390] ss:$28 sps:$4 sm:$0xff]  }
 0x3c2   :  { %4450 = vmatpush3.bf16.msra.mxu0 %v5117_v61  ;;  %3799 = vmatprep.mubr.bf16.mxu0 %v6421_v1  ;;  %v5127_v1 = vld [vmem:[%s6835_s7 + $0x88] ss:$28 sps:$4 sm:$0xff]   ;;  %v5188_v61 = vld [vmem:[%s6835_s7 + $0x558] ss:$28 sps:$4 sm:$0xff]  }
 0x3c3   :  { %3683 = vmatprep.subr.bf16.mxu1 %v5120_v62  ;;  %4451 = vmatprep.subr.bf16.mxu0 %v5121_v63  ;;  %v5191_v62 = vld [vmem:[%s6835_s7 + $0x3cc] ss:$28 sps:$4 sm:$0xff]  }
 0x3c4   :  { %v5189_v63 = vld [vmem:[%s6835_s7 + $0x3c8] ss:$28 sps:$4 sm:$0xff]  }
 0x3c5   :  { %3684 = vmatpush1.bf16.msra.mxu1 %v5118_v2  ;;  %v5194_v2 = vld [vmem:[%s6835_s7 + $0x404] ss:$28 sps:$4 sm:$0xff]  }
 0x3c6   :  { %4452 = vmatpush3.bf16.msra.mxu0 %v5122_v3  ;;  %3685 = vmatprep.subr.bf16.mxu1 %v5125_v4  ;;  %v5200_v3 = vld [vmem:[%s6835_s7 + $0x474] ss:$28 sps:$4 sm:$0xff]  }
 0x3c7   :  { %4453 = vmatprep.subr.bf16.mxu0 %v5126_v5  ;;  %v5198_v4 = vld [vmem:[%s6835_s7 + $0x470] ss:$28 sps:$4 sm:$0xff]  }
 0x3c8   :  { %v5203_v5 = vld [vmem:[%s6835_s7 + $0x4ac] ss:$28 sps:$4 sm:$0xff]  }
 0x3c9   :  { %3686 = vmatpush1.bf16.msra.mxu1 %v5123_v6  ;;  %v5201_v6 = vld [vmem:[%s6835_s7 + $0x4a8] ss:$28 sps:$4 sm:$0xff]  }
 0x3ca   :  { %4454 = vmatpush3.bf16.msra.mxu0 %v5127_v1  ;;  %3687 = vmatprep.subr.bf16.mxu1 %v5130_v7  ;;  %v5206_v1 = vld [vmem:[%s6835_s7 + $0x4e4] ss:$28 sps:$4 sm:$0xff]  }
 0x3cb   :  { %4455 = vmatprep.subr.bf16.mxu0 %v5131_v8  ;;  %v5204_v7 = vld [vmem:[%s6835_s7 + $0x4e0] ss:$28 sps:$4 sm:$0xff]  }
 0x3cc   :  { %v5209_v8 = vld [vmem:[%s6835_s7 + $0x51c] ss:$28 sps:$4 sm:$0xff]  }
 0x3cd   :  { %3688 = vmatpush1.bf16.msra.mxu1 %v5128_v9  ;;  %v5207_v9 = vld [vmem:[%s6835_s7 + $0x518] ss:$28 sps:$4 sm:$0xff]  }
 0x3ce   :  { %4456 = vmatpush3.bf16.msra.mxu0 %v5132_v10  ;;  %3689 = vmatprep.subr.bf16.mxu1 %v5135_v12  ;;  %v5212_v10 = vld [vmem:[%s6835_s7 + $0x554] ss:$28 sps:$4 sm:$0xff]  }
 0x3cf   :  { %4457 = vmatprep.subr.bf16.mxu0 %v5136_v13  ;;  %v5210_v12 = vld [vmem:[%s6835_s7 + $0x550] ss:$28 sps:$4 sm:$0xff]   ;;  %v6790_v13 = vld [vmem:[%s6840_s8] sm:$0x7f] }
 0x3d1   :  { %3690 = vmatpush1.bf16.msra.mxu1 %v5133_v14  ;;  %v2574_v14 = vrot.slane %v6790_v13, %v6034_v51 }
 0x3d2   :  { %4458 = vmatpush3.bf16.msra.mxu0 %v5137_v15  ;;  %3691 = vmatprep.subr.bf16.mxu1 %v5140_v16  ;;  %v2582_v15 = vrot.slane %v6790_v13, %v6037_v52  ;;  %v2578_v16 = vrot.slane %v6790_v13, %v6043_v54 }
 0x3d3   :  { %4459 = vmatprep.subr.bf16.mxu0 %v5141_v17  ;;  %v2586_v17 = vrot.slane %v6790_v13, %v6046_v55 }
 0x3d5   :  { %3692 = vmatpush1.bf16.msra.mxu1 %v5138_v18 }
 0x3d6   :  { %4460 = vmatpush3.bf16.msra.mxu0 %v5142_v19  ;;  %3693 = vmatprep.subr.bf16.mxu1 %v5145_v20 }
 0x3d7   :  { %4461 = vmatprep.subr.bf16.mxu0 %v5146_v21 }
 0x3d9   :  { %3694 = vmatpush1.bf16.msra.mxu1 %v5143_v22 }
 0x3da   :  { %4462 = vmatpush3.bf16.msra.mxu0 %v5147_v23  ;;  %3695 = vmatprep.subr.bf16.mxu1 %v5150_v24 }
 0x3db   :  { %4463 = vmatprep.subr.bf16.mxu0 %v5151_v25 }
 0x3dd   :  { %3696 = vmatpush1.bf16.msra.mxu1 %v5148_v26 }
 0x3de   :  { %4464 = vmatpush3.bf16.msra.mxu0 %v5152_v27  ;;  %3697 = vmatprep.subr.bf16.mxu1 %v5155_v28 }
 0x3df   :  { %3808 = vmatprep.subr.bf16.mxu0 %v5245_v11 }
 0x3e1   :  { %3800 = vmatmul.mubr.bf16.vlgmr.msra.gmra.mrb[12].mxu0 %v6419_v0  ;;  %3698 = vmatpush1.bf16.msra.mxu1 %v5153_v29 }
 0x3e2   :  { %3809 = vmatpush1.bf16.msra.mxu0 %v5156_v30  ;;  %4432 = vmatprep.mubr.msk.bf16.mxu0 %vm1279_vm0, %v6529_v53 }
 0x3e3   :  { %3699 = vmatprep.subr.bf16.mxu1 %v5159_v31  ;;  %3810 = vmatprep.subr.bf16.mxu0 %v5245_v11 }
 0x3e5   :  { %3700 = vmatpush1.bf16.msra.mxu1 %v5157_v32 }
 0x3e6   :  { %3811 = vmatpush1.bf16.msra.mxu0 %v5160_v33  ;;  %3701 = vmatprep.subr.bf16.mxu1 %v5163_v34 }
 0x3e7   :  { %3812 = vmatprep.subr.bf16.mxu0 %v5245_v11 }
 0x3e9   :  { %3702 = vmatpush1.bf16.msra.mxu1 %v5161_v35 }
 0x3ea   :  { %3813 = vmatpush1.bf16.msra.mxu0 %v5164_v36  ;;  %3703 = vmatprep.subr.bf16.mxu1 %v5167_v37 }
 0x3eb   :  { %3814 = vmatprep.subr.bf16.mxu0 %v5245_v11 }
 0x3ed   :  { %3704 = vmatpush1.bf16.msra.mxu1 %v5165_v38 }
 0x3ee   :  { %3815 = vmatpush1.bf16.msra.mxu0 %v5168_v39  ;;  %3705 = vmatprep.subr.bf16.mxu1 %v5171_v40 }
 0x3ef   :  { %3816 = vmatprep.subr.bf16.mxu0 %v5245_v11 }
 0x3f1   :  { %3706 = vmatpush1.bf16.msra.mxu1 %v5169_v41 }
 0x3f2   :  { %3817 = vmatpush1.bf16.msra.mxu0 %v5172_v42  ;;  %3707 = vmatprep.subr.bf16.mxu1 %v5175_v43 }
 0x3f3   :  { %3818 = vmatprep.subr.bf16.mxu0 %v5245_v11 }
 0x3f5   :  { %3708 = vmatpush1.bf16.msra.mxu1 %v5173_v44 }
 0x3f6   :  { %3819 = vmatpush1.bf16.msra.mxu0 %v5176_v45  ;;  %3709 = vmatprep.subr.bf16.mxu1 %v5179_v46 }
 0x3f7   :  { %3820 = vmatprep.subr.bf16.mxu0 %v5245_v11 }
 0x3f9   :  { %3710 = vmatpush1.bf16.msra.mxu1 %v5177_v47 }
 0x3fa   :  { %3821 = vmatpush1.bf16.msra.mxu0 %v5180_v48  ;;  %3711 = vmatprep.subr.bf16.mxu1 %v5183_v56 }
 0x3fb   :  { %3822 = vmatprep.subr.bf16.mxu0 %v5245_v11 }
 0x3fd   :  { %3712 = vmatpush1.bf16.msra.mxu1 %v5181_v57 }
 0x3fe   :  { %3823 = vmatpush1.bf16.msra.mxu0 %v5184_v58  ;;  %3724 = vmatprep.subr.bf16.mxu1 %v5187_v59 }
 0x3ff   :  { %3824 = vmatprep.subr.bf16.mxu0 %v5245_v11  ;;  %v5192_v11 = vld [vmem:[%s6835_s7 + $0x400] ss:$28 sps:$4 sm:$0xff]  }
 0x400   :  { %3714 = vmatmul.mubr.bf16.vlgmr.msra.gmra.mrb[16].mxu1 %v6419_v0  ;;  %v5197_v0 = vld [vmem:[%s6835_s7 + $0x43c] ss:$28 sps:$4 sm:$0xff]  }
 0x401   :  { %3725 = vmatpush1.bf16.msra.mxu1 %v5185_v60  ;;  %4431 = vmatprep.mubr.msk.bf16.mxu1 %vm1279_vm0, %v6529_v53  ;;  %v5195_v53 = vld [vmem:[%s6835_s7 + $0x438] ss:$28 sps:$4 sm:$0xff]  }
 0x402   :  { %3825 = vmatpush1.bf16.msra.mxu0 %v5188_v61  ;;  %3726 = vmatprep.subr.bf16.mxu1 %v5191_v62 }
 0x405   :  { %3841 = vmatmul.mubr.bf16.vlgmr.msra.gmra.mrb[16].mxu0 %v6527_v49  ;;  %3727 = vmatpush1.bf16.msra.mxu1 %v5189_v63 }
 0x406   :  { %3728 = vmatprep.subr.bf16.mxu1 %v5194_v2 }
 0x409   :  { %3729 = vmatpush1.bf16.msra.mxu1 %v5192_v11 }
 0x40a   :  { %3730 = vmatprep.subr.bf16.mxu1 %v5197_v0 }
 0x40d   :  { %3731 = vmatpush1.bf16.msra.mxu1 %v5195_v53 }
 0x40e   :  { %3732 = vmatprep.subr.bf16.mxu1 %v5200_v3 }
 0x411   :  { %3733 = vmatpush1.bf16.msra.mxu1 %v5198_v4 }
 0x412   :  { %3734 = vmatprep.subr.bf16.mxu1 %v5203_v5 }
 0x415   :  { %3735 = vmatpush1.bf16.msra.mxu1 %v5201_v6 }
 0x416   :  { %3736 = vmatprep.subr.bf16.mxu1 %v5206_v1 }
 0x419   :  { %3737 = vmatpush1.bf16.msra.mxu1 %v5204_v7 }
 0x41a   :  { %3738 = vmatprep.subr.bf16.mxu1 %v5209_v8 }
 0x41d   :  { %3739 = vmatpush1.bf16.msra.mxu1 %v5207_v9 }
 0x41e   :  { %3740 = vmatprep.subr.bf16.mxu1 %v5212_v10 }
 0x421   :  { %3741 = vmatpush1.bf16.msra.mxu1 %v5210_v12 }
 0x424   :  { %3757 = vmatmul.mubr.bf16.vlgmr.msra.gmra.mrb[16].mxu1 %v6527_v49 }
 0x493   :  { %v3586_v18 = vpop.f32.mrb[12].mxu1  ;;  %v3672_v19 = vpop.f32.mrb[8].mxu0 }
 0x494   :  { %v4483_v49 = vadd.f32 %v3586_v18, %v2574_v14  ;;  %v4487_v20 = vadd.f32 %v3672_v19, %v2582_v15  ;;  %v3588_v21 = vpop.f32.mrb[13].mxu1  ;;  %v3674_v22 = vpop.f32.mrb[9].mxu0 }
 0x495   :  { %v4484_v23 = vadd.f32 %v3588_v21, %v2578_v16  ;;  %v4488_v24 = vadd.f32 %v3674_v22, %v2586_v17  ;;  %v3590_v25 = vpop.f32.mrb[14].mxu1  ;;  %v3676_v26 = vpop.f32.mrb[10].mxu0 }
 0x496   :  { %v3849_v51 = vmul.f32 0.5, %v4483_v49  ;;  %v3851_v27 = vmul.f32 0.5, %v4487_v20  ;;  %v4485_v28 = vadd.f32 %v3590_v25, %v2574_v14  ;;  %v4489_v52 = vadd.f32 %v3676_v26, %v2582_v15  ;;  %v3592_v29 = vpop.f32.mrb[15].mxu1  ;;  %v3678_v30 = vpop.f32.mrb[11].mxu0 }
 0x497   :  { %v3850_v54 = vmul.f32 0.5, %v4484_v23  ;;  %v3852_v31 = vmul.f32 0.5, %v4488_v24  ;;  %v4486_v32 = vadd.f32 %v3592_v29, %v2578_v16  ;;  %v4490_v55 = vadd.f32 %v3678_v30, %v2586_v17 }
 0x498   :  { %5217 = vtanh.f32 %v3849_v51  ;;  %v3856_v33 = vmul.f32 0.5, %v4485_v28  ;;  %v3858_v34 = vmul.f32 0.5, %v4489_v52  ;;  %v2597_v14 = vsub.s32 6, %v6031_v50 }
 0x499   :  { %5219 = vtanh.f32 %v3851_v27  ;;  %v3857_v35 = vmul.f32 0.5, %v4486_v32  ;;  %v3859_v36 = vmul.f32 0.5, %v4490_v55 }
 0x49a   :  { %5221 = vtanh.f32 %v3850_v54  ;;  %v2598_v15 = vrot.slane %v6790_v13, %v2597_v14  ;;  %v2589_v54 = vsub.s32 4, %v6031_v50 }
 0x49b   :  { %5223 = vtanh.f32 %v3852_v31  ;;  %v2593_v31 = vsub.s32 5, %v6031_v50 }
 0x49c   :  { %5225 = vtanh.f32 %v3856_v33  ;;  %v2590_v32 = vrot.slane %v6790_v13, %v2589_v54 }
 0x49d   :  { %5227 = vtanh.f32 %v3858_v34  ;;  %v2594_v55 = vrot.slane %v6790_v13, %v2593_v31 }
 0x49e   :  { %5229 = vtanh.f32 %v3857_v35 }
 0x49f   :  { %5231 = vtanh.f32 %v3859_v36 }
 0x4a2   :  { %v5218_v37 = vpop.eup %5217 }
 0x4a3   :  { %v5220_v38 = vpop.eup %5219  ;;  %v3877_v39 = vmul.f32 0.5, %v5218_v37 }
 0x4a4   :  { %v5222_v40 = vpop.eup %5221  ;;  %v3879_v41 = vmul.f32 0.5, %v5220_v38 }
 0x4a5   :  { %v5224_v42 = vpop.eup %5223  ;;  %v3891_v43 = vadd.f32 0.5, %v3877_v39  ;;  %v3878_v44 = vmul.f32 0.5, %v5222_v40 }
 0x4a6   :  { %v5226_v45 = vpop.eup %5225  ;;  %v3893_v46 = vadd.f32 0.5, %v3879_v41  ;;  %v3880_v47 = vmul.f32 0.5, %v5224_v42 }
 0x4a7   :  { %v5228_v48 = vpop.eup %5227  ;;  %v3892_v56 = vadd.f32 0.5, %v3878_v44  ;;  %v3884_v57 = vmul.f32 0.5, %v5226_v45 }
 0x4a8   :  { %v5230_v58 = vpop.eup %5229  ;;  %v3894_v59 = vadd.f32 0.5, %v3880_v47  ;;  %v3886_v60 = vmul.f32 0.5, %v5228_v48 }
 0x4a9   :  { %v5232_v61 = vpop.eup %5231  ;;  %v4441_v62 = vpack.c.bf16 %v3892_v56, %v3891_v43  ;;  %v3898_v63 = vadd.f32 0.5, %v3884_v57  ;;  %v3885_v2 = vmul.f32 0.5, %v5230_v58 }
 0x4aa   :  { %v4442_v11 = vpack.c.bf16 %v3894_v59, %v3893_v46  ;;  %v3900_v0 = vadd.f32 0.5, %v3886_v60  ;;  %v3887_v53 = vmul.f32 0.5, %v5232_v61 }
 0x4ab   :  { %3949 = vst [vmem:[%s6841_s10] sm:$0xff] %v4441_v62  ;;  %v3899_v3 = vadd.f32 0.5, %v3885_v2 }
 0x4ac   :  { %3950 = vst [vmem:[%s6841_s10 + $0x8] sm:$0xff] %v4442_v11  ;;  %v3901_v4 = vadd.f32 0.5, %v3887_v53 }
 0x4ad   :  { %v4445_v5 = vpack.c.bf16 %v3899_v3, %v3898_v63 }
 0x4ae   :  { %v4446_v6 = vpack.c.bf16 %v3901_v4, %v3900_v0 }
 0x4af   :  { %3954 = vst [vmem:[%s6841_s10 + $0x1c] sm:$0xff] %v4445_v5 }
 0x4b0   :  { %3955 = vst [vmem:[%s6841_s10 + $0x24] sm:$0xff] %v4446_v6 }
 0x4b4   :  { %v4465_v1 = vpop.f32.mrb[12].mxu0 }
 0x4b5   :  { %v4466_v7 = vpop.f32.mrb[13].mxu0 }
 0x4b6   :  { %v4467_v8 = vadd.f32 %v4466_v7, %v4465_v1  ;;  %v4468_v9 = vpop.f32.mrb[14].mxu0 }
 0x4b7   :  { %v4469_v10 = vpop.f32.mrb[15].mxu0 }
 0x4b8   :  { %v4470_v12 = vadd.f32 %v4469_v10, %v4468_v9  ;;  %v3802_v16 = vadd.f32 %v4467_v8, %v2598_v15 }
 0x4ba   :  { %v3805_v49 = vadd.f32 %v4470_v12, %v2598_v15 }
 0x4d8   :  { %v3842_v17 = vpop.f32.mrb[16].mxu0 }
 0x4d9   :  { %v3843_v18 = vadd.f32 %v3842_v17, %v3802_v16  ;;  %v3844_v19 = vpop.f32.mrb[17].mxu0 }
 0x4da   :  { %v3845_v20 = vpop.f32.mrb[18].mxu0 }
 0x4db   :  { %v3855_v21 = vmul.f32 0.5, %v3843_v18  ;;  %v3846_v22 = vadd.f32 %v3845_v20, %v3805_v49  ;;  %v3847_v23 = vpop.f32.mrb[19].mxu0 }
 0x4dd   :  { %5233 = vtanh.f32 %v3855_v21  ;;  %v3862_v24 = vmul.f32 0.5, %v3846_v22 }
 0x4df   :  { %5235 = vtanh.f32 %v3862_v24 }
 0x4e7   :  { %v5234_v25 = vpop.eup %5233 }
 0x4e8   :  { %v3883_v26 = vmul.f32 0.5, %v5234_v25 }
 0x4e9   :  { %v5236_v51 = vpop.eup %5235 }
 0x4ea   :  { %v3897_v27 = vadd.f32 0.5, %v3883_v26  ;;  %v3890_v28 = vmul.f32 0.5, %v5236_v51 }
 0x4ec   :  { %v4444_v52 = vpack.c.bf16 %v3897_v27, %v3897_v27  ;;  %v3904_v29 = vadd.f32 0.5, %v3890_v28 }
 0x4ee   :  { %3953 = vst.msk [vmem:[%s6841_s10 + $0x18] sm:$0xf] %vm3952_vm1, %v4444_v52  ;;  %v4448_v30 = vpack.c.bf16 %v3904_v29, %v3904_v29 }
 0x4f0   :  { %3957 = vst.msk [vmem:[%s6841_s10 + $0x34] sm:$0xf] %vm3952_vm1, %v4448_v30 }
 0x4f7   :  { %v3758_v33 = vpop.f32.mrb[16].mxu1 }
 0x4f8   :  { %v4491_v34 = vadd.f32 %v3758_v33, %v2590_v32  ;;  %v3760_v35 = vpop.f32.mrb[17].mxu1 }
 0x4f9   :  { %v4492_v36 = vadd.f32 %v3760_v35, %v2594_v55  ;;  %v3762_v37 = vpop.f32.mrb[18].mxu1 }
 0x4fa   :  { %v3853_v38 = vmul.f32 0.5, %v4491_v34  ;;  %v4493_v39 = vadd.f32 %v3762_v37, %v2590_v32  ;;  %v3764_v40 = vpop.f32.mrb[19].mxu1 }
 0x4fb   :  { %v3854_v41 = vmul.f32 0.5, %v4492_v36  ;;  %v4494_v42 = vadd.f32 %v3764_v40, %v2594_v55 }
 0x4fc   :  { %5237 = vtanh.f32 %v3853_v38  ;;  %v3860_v43 = vmul.f32 0.5, %v4493_v39 }
 0x4fd   :  { %5239 = vtanh.f32 %v3854_v41  ;;  %v3861_v44 = vmul.f32 0.5, %v4494_v42 }
 0x4fe   :  { %5241 = vtanh.f32 %v3860_v43 }
 0x4ff   :  { %5243 = vtanh.f32 %v3861_v44 }
 0x506   :  { %v5238_v50 = vpop.eup %5237 }
 0x507   :  { %v5240_v45 = vpop.eup %5239  ;;  %v3881_v46 = vmul.f32 0.5, %v5238_v50 }
 0x508   :  { %v5242_v13 = vpop.eup %5241  ;;  %v3882_v47 = vmul.f32 0.5, %v5240_v45 }
 0x509   :  { %v5244_v48 = vpop.eup %5243  ;;  %v3895_v56 = vadd.f32 0.5, %v3881_v46  ;;  %v3888_v57 = vmul.f32 0.5, %v5242_v13 }
 0x50a   :  { %v3896_v58 = vadd.f32 0.5, %v3882_v47  ;;  %v3889_v59 = vmul.f32 0.5, %v5244_v48 }
 0x50b   :  { %v3902_v60 = vadd.f32 0.5, %v3888_v57 }
 0x50c   :  { %v4443_v61 = vpack.c.bf16 %v3896_v58, %v3895_v56  ;;  %v3903_v62 = vadd.f32 0.5, %v3889_v59 }
 0x50e   :  { %3951 = vst [vmem:[%s6841_s10 + $0x10] sm:$0xff] %v4443_v61  ;;  %v4447_v63 = vpack.c.bf16 %v3903_v62, %v3902_v60 }
 0x510   :  { %3956 = vst [vmem:[%s6841_s10 + $0x2c] sm:$0xff] %v4447_v63 }

</bundles_post_ra>
